<compile_context>
chip_gen: v6e
topology: v6e:2x2x1
jax: 0.10.0
libtpu: 0.0.40
codegen_flags: <defaults>
</compile_context>

<pallas_src>
from functools import lru_cache

import numpy as np
import jax
import jax.numpy as jnp
from jax import lax
from jax.experimental import pallas as pl
from jax.experimental.pallas import tpu as pltpu

TILE_N_MAX = 512  # preferred pair (lane) tile width


def _round_up(v, m):
    return (v + m - 1) // m * m


def _choose_tile(n_pair, tile_max):
    """Lane tile (multiple of 128).  Prefer an even number of tiles so the
    "parallel" grid axis splits evenly across v7x's 2 TensorCores."""
    t = min(tile_max, _round_up(max(n_pair, 1), 128))
    n_tiles = -(-n_pair // t)
    if n_tiles > 1 and n_tiles % 2 == 1:
        t_even = _round_up(-(-n_pair // (n_tiles - 1)), 128)
        if t_even <= 2 * tile_max:   # allow up to 2x tile to even out the grid
            t = t_even
    return t


@lru_cache(maxsize=None)
def _triu_pairs(n_atom: int) -> np.ndarray:
    """Static i<j pair indices (row-major, matches torch.triu_indices(n, n, 1))."""
    rows, cols = np.triu_indices(n_atom, k=1)
    return np.stack([rows, cols], axis=0).astype(np.int32)


# ----------------------------------------------------------------------------
# Kernel helpers
# ----------------------------------------------------------------------------

def _build_dmat(idx_ref, a_pad):
    """(A_pad, T) bf16 fused-gather matrix: column k is +1 at row i0[k], -1 at i1[k].

    +-1/0 are exact in bf16; keeping the MXU weight operand in bf16 halves the
    vector-store traffic needed to materialize it."""
    t = idx_ref.shape[1]
    idx = idx_ref[...]                                              # (2, T) int32
    iota = lax.broadcasted_iota(jnp.int32, (a_pad, t), 0)           # (A_pad, T)
    dmat_f32 = ((iota == idx[0:1, :]).astype(jnp.float32)
                - (iota == idx[1:2, :]).astype(jnp.float32))
    return dmat_f32.astype(jnp.bfloat16)


def _gather_delta(x_ref, dmat):
    """One default-precision bf16 MXU matmul -> f32 (x_i - x_j) per coordinate.

    x_ref rows are [plane, coord, batch]-stacked bf16 planes (x = p0+p1+p2 exactly),
    so the single dot streams 9*b_pad rows through one weight load of dmat and the
    plane sum reproduces the full-f32 result."""
    rows = x_ref.shape[0]
    b3 = rows // 3                      # 3 coords * b_pad
    b_pad = b3 // 3
    r = jnp.dot(x_ref[...], dmat, preferred_element_type=jnp.float32)  # (9*b_pad, T)
    dsum = r[0:b3] + r[b3:2 * b3] + r[2 * b3:3 * b3]                   # (3*b_pad, T)
    return [dsum[c * b_pad:(c + 1) * b_pad] for c in range(3)]         # 3 x (b_pad, T)


def _distance_kernel_pbc(idx_ref, x_ref, cell_ref, cinv_ref, pbc_ref, o_ref):
    # idx_ref : (2, T)             int32, VMEM -- pair indices for this lane tile
    # x_ref   : (9*B_pad, A_pad)   bf16,  VMEM -- stacked coord planes, resident
    # cell_ref: (3, 3)             f32,   SMEM -- (sanitized) lattice vectors (rows)
    # cinv_ref: (3, 3)             f32,   SMEM -- inverse cell
    # pbc_ref : (3,)               f32,   SMEM -- 1.0 periodic / 0.0 non-periodic
    # o_ref   : (B_pad, T)         f32
    a_pad = x_ref.shape[1]
    dmat = _build_dmat(idx_ref, a_pad)
    delta = _gather_delta(x_ref, dmat)

    # Minimum-image correction (masked by pbc; exact no-op on non-periodic axes).
    shift = []
    for a in range(3):
        frac_a = (delta[0] * cinv_ref[0, a]
                  + delta[1] * cinv_ref[1, a]
                  + delta[2] * cinv_ref[2, a])
        shift.append(jnp.floor(frac_a + 0.5) * pbc_ref[a])

    d2 = jnp.zeros_like(delta[0])
    for c in range(3):
        dc = delta[c] - (shift[0] * cell_ref[0, c]
                         + shift[1] * cell_ref[1, c]
                         + shift[2] * cell_ref[2, c])
        d2 = d2 + dc * dc
    o_ref[...] = jnp.sqrt(d2).astype(o_ref.dtype)


def _distance_kernel_free(idx_ref, x_ref, o_ref):
    # No-PBC specialization: skips the min-image epilogue and SMEM scalar reads.
    a_pad = x_ref.shape[1]
    dmat = _build_dmat(idx_ref, a_pad)
    delta = _gather_delta(x_ref, dmat)
    d2 = delta[0] * delta[0] + delta[1] * delta[1] + delta[2] * delta[2]
    o_ref[...] = jnp.sqrt(d2).astype(o_ref.dtype)


# ----------------------------------------------------------------------------
# Wrapper
# ----------------------------------------------------------------------------

def _split_bf16_planes(x3ba):
    """Split f32 (3, B, A) coordinates into three bf16 planes, x = p0+p1+p2 exactly."""
    p0 = x3ba.astype(jnp.bfloat16)
    r1 = x3ba - p0.astype(jnp.float32)
    p1 = r1.astype(jnp.bfloat16)
    r2 = r1 - p1.astype(jnp.float32)
    p2 = r2.astype(jnp.bfloat16)
    return jnp.stack([p0, p1, p2], axis=0)          # (3 planes, 3 coords, B, A) bf16


def distance_neighbor_list(x, cell, pbc, cut_off, *, tile_n_max=TILE_N_MAX):
    """Forward pass of DistanceNeighborList.

    x: [n_batch, n_atom, 3]; cell: [3, 3]; pbc: [3] (bool).
    Returns (distances [n_batch, n_pair] f32, indices [2, n_pair] int32) over all
    i<j pairs, minimum-image along periodic axes.  `cut_off` kept for API fidelity;
    see the TODO at the top about the dynamic cutoff filter.
    """
    del cut_off  # TODO(synk): no static-shape equivalent of the distance cutoff filter
    x = jnp.asarray(x, jnp.float32)
    n_batch, n_atom, _ = x.shape

    idx_np = _triu_pairs(int(n_atom))
    n_pair = idx_np.shape[1]

    tile_n = _choose_tile(n_pair, tile_n_max)
    n_pad = _round_up(n_pair, tile_n)
    b_pad = _round_up(n_batch, 8)
    a_pad = _round_up(n_atom, 128)

    indices = jnp.asarray(idx_np)
    idx_padded = jnp.pad(indices, ((0, 0), (0, n_pad - n_pair)))    # padded pairs -> (0,0)

    x3ba = jnp.transpose(x, (2, 0, 1))                              # (3, B, A) f32
    planes = _split_bf16_planes(x3ba)                               # (3, 3, B, A) bf16
    planes = jnp.pad(planes, ((0, 0), (0, 0),
                              (0, b_pad - n_batch), (0, a_pad - n_atom)))
    lhs = planes.reshape(9 * b_pad, a_pad)                          # (9*B_pad, A_pad) bf16

    # Static no-PBC specialization when pbc is a concrete (non-traced) all-False value.
    try:
        pbc_static = np.asarray(pbc)
    except Exception:   # traced under jit -> fall back to the masked PBC kernel
        pbc_static = None
    no_pbc = pbc_static is not None and not bool(np.any(pbc_static))

    grid = (n_pad // tile_n,)
    out_shape = jax.ShapeDtypeStruct((b_pad, n_pad), jnp.float32)
    idx_spec = pl.BlockSpec((2, tile_n), lambda j: (0, j))
    x_spec = pl.BlockSpec((9 * b_pad, a_pad), lambda j: (0, 0))     # resident coords
    out_spec = pl.BlockSpec((b_pad, tile_n), lambda j: (0, j))
    cparams = pltpu.CompilerParams(dimension_semantics=("parallel",))

    if no_pbc:
        dist_padded = pl.pallas_call(
            _distance_kernel_free,
            out_shape=out_shape,
            grid_spec=pltpu.PrefetchScalarGridSpec(
                num_scalar_prefetch=0, grid=grid,
                in_specs=[idx_spec, x_spec],
                out_specs=out_spec),
            compiler_params=cparams,
        )(idx_padded, lhs)
    else:
        pbc_arr = jnp.asarray(pbc)
        pbc_mask = pbc_arr.astype(jnp.float32).reshape(3)
        cell = jnp.asarray(cell, jnp.float32).reshape(3, 3)
        # Replace non-periodic rows by identity rows before inversion so a degenerate
        # dummy row cannot produce inf/NaN in cell_inv (shift on those axes is masked).
        eye = jnp.eye(3, dtype=jnp.float32)
        cell_eff = jnp.where(pbc_arr.reshape(3, 1), cell, eye)
        cell_inv = jnp.linalg.inv(cell_eff)

        dist_padded = pl.pallas_call(
            _distance_kernel_pbc,
            out_shape=out_shape,
            grid_spec=pltpu.PrefetchScalarGridSpec(
                num_scalar_prefetch=0, grid=grid,
                in_specs=[idx_spec, x_spec,
                          pl.BlockSpec(memory_space=pltpu.MemorySpace.SMEM),  # cell
                          pl.BlockSpec(memory_space=pltpu.MemorySpace.SMEM),  # cell_inv
                          pl.BlockSpec(memory_space=pltpu.MemorySpace.SMEM)], # pbc mask
                out_specs=out_spec),
            compiler_params=cparams,
        )(idx_padded, lhs, cell_eff, cell_inv, pbc_mask)

    if b_pad == n_batch and n_pad == n_pair:
        distances = dist_padded                      # no extra HBM round-trip copy
    else:
        distances = dist_padded[:n_batch, :n_pair]
    return distances, indices


class DistanceNeighborList:
    """JAX/Pallas counterpart of the torch module (forward only)."""

    def __init__(self, cut_off):
        self.cut_off = cut_off

    def __call__(self, x, cell, pbc):
        return distance_neighbor_list(x, cell, pbc, self.cut_off)


if __name__ == "__main__":
    key = jax.random.PRNGKey(0)
    n_batch, n_atom = 2, 48          # 48*47/2 = 1128 pairs -> 2 lane tiles of 640
    box = 10.0
    cut_off = 8.0

    x = jax.random.uniform(key, (n_batch, n_atom, 3), jnp.float32,
                           minval=0.0, maxval=box)

    idx_ref_np = np.stack(np.triu_indices(n_atom, k=1)).astype(np.int32)

    def reference(x, cell, pbc):
        i0, i1 = idx_ref_np
        d = x[:, i0, :] - x[:, i1, :]                               # (B, P, 3)
        pbc_b = jnp.asarray(pbc)
        mask = pbc_b.astype(jnp.float32)
        cell_eff = jnp.where(pbc_b[:, None], jnp.asarray(cell, jnp.float32),
                             jnp.eye(3, dtype=jnp.float32))
        inv = jnp.linalg.inv(cell_eff)
        frac = jnp.einsum('bpc,ca->bpa', d, inv,
                          precision=lax.Precision.HIGHEST)
        shift = jnp.floor(frac + 0.5) * mask
        d = d - jnp.einsum('bpa,ac->bpc', shift, cell_eff,
                           precision=lax.Precision.HIGHEST)
        return jnp.sqrt(jnp.sum(d * d, axis=-1))

    module = DistanceNeighborList(cut_off)

    # --- non-periodic system (specialized no-PBC kernel) -------------------
    cell = jnp.eye(3, dtype=jnp.float32)      # ignored when pbc is all False
    pbc = jnp.zeros((3,), dtype=bool)
    dist, idx = module(x, cell, pbc)
    dist = jax.block_until_ready(dist)
    n_pair = n_atom * (n_atom - 1) // 2
    assert dist.shape == (n_batch, n_pair)
    assert idx.shape == (2, n_pair)
    assert np.array_equal(np.asarray(idx), idx_ref_np)
    ref = reference(x, cell, pbc)
    assert jnp.allclose(dist, ref, rtol=1e-5, atol=2e-5), \
        float(jnp.max(jnp.abs(dist - ref)))

    # --- periodic system (minimum image) -----------------------------------
    cell_p = box * jnp.eye(3, dtype=jnp.float32)
    pbc_p = jnp.ones((3,), dtype=bool)
    dist_p, _ = module(x, cell_p, pbc_p)
    dist_p = jax.block_until_ready(dist_p)
    ref_p = reference(x, cell_p, pbc_p)
    assert jnp.allclose(dist_p, ref_p, rtol=1e-5, atol=2e-5), \
        float(jnp.max(jnp.abs(dist_p - ref_p)))

    print("KERNEL_OK")
</pallas_src>

<mosaic_0001>
module attributes {stable_mosaic.version = 11 : i64} {
  func.func @_distance_kernel_free(%arg0: i32, %arg1: memref<2x640xi32, #tpu.memory_space<vmem>>, %arg2: memref<72x128xbf16, #tpu.memory_space<vmem>>, %arg3: memref<8x640xf32, #tpu.memory_space<vmem>>) attributes {dimension_semantics = [#tpu.dimension_semantics<parallel>], iteration_bounds = array<i64: 2>, scalar_prefetch = 0 : i64, scratch_operands = 0 : i64, tpu.core_type = #tpu.core_type<tc>, window_params = [{transform_indices = @transform_0, window_bounds = array<i64: 2, 640>}, {pipeline_mode = #tpu.pipeline_mode<synchronous>, transform_indices = @transform_1, window_bounds = array<i64: 72, 128>}, {transform_indices = @transform_2, window_bounds = array<i64: 8, 640>}]} {
    %c0 = arith.constant 0 : index
    %c0_0 = arith.constant 0 : index
    %0 = vector.load %arg1[%c0, %c0_0] : memref<2x640xi32, #tpu.memory_space<vmem>>, vector<2x640xi32>
    %1 = tpu.iota {dimensions = array<i32: 0>} : vector<128x640xi32>
    %2 = vector.extract_strided_slice %0 {offsets = [0, 0], sizes = [1, 640], strides = [1, 1]} : vector<2x640xi32> to vector<1x640xi32>
    %3 = vector.broadcast %2 : vector<1x640xi32> to vector<128x640xi32>
    %4 = arith.cmpi eq, %1, %3 : vector<128x640xi32>
    %5 = arith.extui %4 : vector<128x640xi1> to vector<128x640xi32>
    %6 = arith.sitofp %5 : vector<128x640xi32> to vector<128x640xf32>
    %7 = vector.extract_strided_slice %0 {offsets = [1, 0], sizes = [1, 640], strides = [1, 1]} : vector<2x640xi32> to vector<1x640xi32>
    %8 = vector.broadcast %7 : vector<1x640xi32> to vector<128x640xi32>
    %9 = arith.cmpi eq, %1, %8 : vector<128x640xi32>
    %10 = arith.extui %9 : vector<128x640xi1> to vector<128x640xi32>
    %11 = arith.sitofp %10 : vector<128x640xi32> to vector<128x640xf32>
    %12 = arith.subf %6, %11 : vector<128x640xf32>
    %13 = arith.truncf %12 : vector<128x640xf32> to vector<128x640xbf16>
    %c0_1 = arith.constant 0 : index
    %c0_2 = arith.constant 0 : index
    %14 = vector.load %arg2[%c0_1, %c0_2] : memref<72x128xbf16, #tpu.memory_space<vmem>>, vector<72x128xbf16>
    %cst = arith.constant dense<0.000000e+00> : vector<72x640xf32>
    %15 = tpu.matmul %14, %13, %cst {dimension_numbers = #tpu.dot_dimension_numbers<[1], [0], [0], [1], [0, 0, 1, 1], [], []>} : vector<72x128xbf16>, vector<128x640xbf16>, vector<72x640xf32> -> vector<72x640xf32>
    %16 = vector.extract_strided_slice %15 {offsets = [0, 0], sizes = [24, 640], strides = [1, 1]} : vector<72x640xf32> to vector<24x640xf32>
    %17 = vector.extract_strided_slice %15 {offsets = [24, 0], sizes = [24, 640], strides = [1, 1]} : vector<72x640xf32> to vector<24x640xf32>
    %18 = arith.addf %16, %17 : vector<24x640xf32>
    %19 = vector.extract_strided_slice %15 {offsets = [48, 0], sizes = [24, 640], strides = [1, 1]} : vector<72x640xf32> to vector<24x640xf32>
    %20 = arith.addf %18, %19 : vector<24x640xf32>
    %21 = vector.extract_strided_slice %20 {offsets = [0, 0], sizes = [8, 640], strides = [1, 1]} : vector<24x640xf32> to vector<8x640xf32>
    %22 = vector.extract_strided_slice %20 {offsets = [8, 0], sizes = [8, 640], strides = [1, 1]} : vector<24x640xf32> to vector<8x640xf32>
    %23 = vector.extract_strided_slice %20 {offsets = [16, 0], sizes = [8, 640], strides = [1, 1]} : vector<24x640xf32> to vector<8x640xf32>
    %24 = arith.mulf %21, %21 : vector<8x640xf32>
    %25 = arith.mulf %22, %22 : vector<8x640xf32>
    %26 = arith.addf %24, %25 : vector<8x640xf32>
    %27 = arith.mulf %23, %23 : vector<8x640xf32>
    %28 = arith.addf %26, %27 : vector<8x640xf32>
    %29 = math.sqrt %28 : vector<8x640xf32>
    %c0_3 = arith.constant 0 : index
    %c0_4 = arith.constant 0 : index
    %30 = vector.load %arg3[%c0_3, %c0_4] : memref<8x640xf32, #tpu.memory_space<vmem>>, vector<8x640xf32>
    tpu.vector_store %arg3[%c0_3, %c0_4], %29 {strides = array<i32>} : memref<8x640xf32, #tpu.memory_space<vmem>>, vector<8x640xf32>,
    return
  }
  func.func @transform_0(%arg0: i32) -> (i32, i32) {
    %c0_i32 = arith.constant 0 : i32
    %c0_i32_0 = arith.constant 0 : i32
    return %c0_i32, %arg0 : i32, i32
  }
  func.func @transform_1(%arg0: i32) -> (i32, i32) {
    %c0_i32 = arith.constant 0 : i32
    %c0_i32_0 = arith.constant 0 : i32
    %c0_i32_1 = arith.constant 0 : i32
    return %c0_i32, %c0_i32_0 : i32, i32
  }
  func.func @transform_2(%arg0: i32) -> (i32, i32) {
    %c0_i32 = arith.constant 0 : i32
    %c0_i32_0 = arith.constant 0 : i32
    return %c0_i32, %arg0 : i32, i32
  }
}

</mosaic_0001>

<bundles_post_ra>
// kernel: tpu_custom_call.1
= control target key start
LH: loop header
LB: loop body
LE: loop exit
PB: predicated region body
PF: predicated region fallthrough
CT: control target
= control target key end

     0   :  { %7 = vsyncpa [#allocation3], 0  ;;  %s2600_s0 = inlined_call_operand.hbm [shape: s32[2,1280], index: 0, kind: input, shape index: {}]   ;;  %s2601_s1 = inlined_call_operand.hbm [shape: bf16[72,128], index: 1, kind: input, shape index: {}]   ;;  %s2602_s2 = inlined_call_operand.hbm [shape: f32[8,1280], index: 2, kind: output, shape index: {}]  }
   0x1   :  { %9 = vsyncpa [#allocation3 + $0x1], 0 }
   0x2   :  { %10 = vsyncpa [#allocation6], 0 }
   0x3   :  { %11 = vsyncpa [#allocation4], 0 }
   0x4   :  { %13 = vsyncpa [#allocation4 + $0x1], 0  ;;  %s1807_s9 = smov 0   ;;  %s1809_s10 = smov 0  }
   0x5   :  { %s1811_s11 = smov 0   ;;  %s1813_s12 = smov 0  }
   0x6 LB: > { %s1828_s13 = sadd.s32 4294967295, %s1782_s12   ;;  %s1338_s14 = sadd.s32 4294967294, %s1782_s12   ;;  %s1782_s12 = sphi %s1813_s12, %s2624_s12   ;;  %s1778_s11 = sphi %s1811_s11, %s2623_s11   ;;  %s1774_s10 = sphi %s1809_s10, %s2622_s10   ;;  %s1770_s9 = sphi %s1807_s9, %s2621_s9  }
   0x7   : > { %p39_p0 = scmp.ne.s32.totalorder %s1774_s10, %s1770_s9  ;;  %p2603_p1 = scmp.eq.s32.totalorder %s1828_s13, 0 }
   0x8   : > { %p90_p3 = scmp.eq.s32.totalorder %s1338_s14, 1  ;;  %p1339_p5 = scmp.ge.s32.totalorder %s1782_s12, 1 }
   0x9   : > { %p1837_p4 = por %p2603_p1, %p39_p0  ;;  %p97_p7 = scmp.lt.s32.totalorder %s1782_s12, 3 }
   0xa   : > { %p1842_p6 = por %p90_p3, %p39_p0  ;;  %s1784_s18 = smov [#allocation5]  }
   0xb   : > { %s2607_s15 = scalar_select %p1837_p4, 1, 0 }
   0xc   : > { %s2608_s16 = scalar_select %p1842_p6, 1, 0 }
   0xd   : > { %p1847_p8 = pnand %p1339_p5, %p97_p7  ;;  %s109_s19 = sshll.u32 %s1784_s18, 4  ;;  %s110_s19 = int_to_ptr.vmem [resolvable:$true] %s109_s19 }
   0xe   : > { %s1861_s21 = sadd.s32 1, %s1782_s12   ;;  %s26_s22 = sadd.s32 1, %s1778_s11 }
   0xf   : > { %s2609_s17 = scalar_select %p1847_p8, 1, 0 }
  0x10   : > { %p1591_p9 = pneg %p1847_p8  ;;  %s23_s23 = ssub.s32 %s1782_s12, %s1861_s21 }
  0x11   : > { %s1671_s24 = scalar_lea.vmem %s110_s19, 576  ;;  %p1679_p5 = scmp.lt.s32.totalorder %s110_s19, %s110_s19 }
  0x12   : > { %p1856_p11 = pnand %p1591_p9, %p2603_p1  ;;  %p1672_p13 = scmp.ne.s32.totalorder %s110_s19, %s1671_s24 }
  0x13   : > { %p1680_p7 = scmp.lt.s32.totalorder %s1671_s24, %s1671_s24 }
  0x14   : > { %p1662_p12 = pneg %p1856_p11 }
  0x15   : > { %p1681_p10 = por %p1680_p7, %p1679_p5 }
  0x16   : > { %p1674_p0 = pnand %p1672_p13, %p1662_p12 }
  0x18   : > { %p1675_p3 = pneg %p1674_p0 }
  0x1a   : > { %p1682_p2 = pnand %p1681_p10, %p1675_p3 }
  0x1c   : > { %1685 = shalt.err (!%p1682_p2)
}
  0x1d   : > { %s1785_s25 = smov 64   ;;  %s1786_s26 = smov 4  }
  0x1e   : > { %1594 = dma.hbm_to_vmem [thread:$0]  (!%p1856_p11), %s2601_s1, 576, %s110_s19, [#allocation6], %s1785_s25, %s1785_s25, %s1786_s26  }
  0x1f   : > { %p24_p9 = scmp.eq.s32.totalorder %s23_s23, 0  ;;  %p33_p12 = scmp.ne.s32.totalorder %s1778_s11, %s1774_s10 }
  0x20   : > { %p34_p10 = scmp.eq.s32.totalorder %s1782_s12, 0  ;;  %p1604_p2 = scmp.lt.s32.totalorder %s1782_s12, 2 }
  0x21   : > { %s1878_s29 = scalar_select %p24_p9, %s1778_s11, %s26_s22  }
  0x22   : > { %p35_p13 = por %p34_p10, %p33_p12  ;;  %p2611_p0 = scmp.eq.s32.totalorder %s1828_s13, 1 }
  0x23   : > { %s123_s3 = sand.u32 1, %s1778_s11   ;;  %s1513_s4 = smul.u32 160, %s1782_s12 }
  0x24   : > { %p1882_p3 = por %p2611_p0, %p33_p12  ;;  %s1580_s5 = smul.u32 10, %s123_s3 }
  0x25   : > { %p1888_p5 = pnand %p1604_p2, %p35_p13  ;;  %s1895_s14 = scalar_lea.hbm %s2600_s0, %s1513_s4 }
  0x26   : > { %s2612_s30 = scalar_select %p1882_p3, 1, 0 }
  0x27   : > { %s127_s18 = scalar_lea.vmem [#allocation2], %s1580_s5  ;;  %s124_s20 = scalar_lea.sflag [#allocation3], %s123_s3 }
  0x28   : > { %s135_s19 = sshll.u32 %s127_s18, 4  ;;  %s1686_s22 = scalar_lea.hbm %s1895_s14, 160  ;;  %s136_s19 = int_to_ptr.vmem [resolvable:$true] %s135_s19 }
  0x29   : > { %p1687_p11 = scmp.ne.s32.totalorder %s1895_s14, %s1686_s22  ;;  %p1688_p7 = pneg %p1888_p5 }
  0x2a   : > { %s1691_s25 = scalar_lea.hbm %s2600_s0, 320  ;;  %p1692_p10 = scmp.lt.s32.totalorder %s1895_s14, %s2600_s0 }
  0x2b   : > { %p1689_p9 = pnand %p1688_p7, %p1687_p11  ;;  %p1693_p2 = scmp.lt.s32.totalorder %s1691_s25, %s1686_s22 }
  0x2d   : > { %p1690_p12 = pneg %p1689_p9  ;;  %p1694_p13 = por %p1693_p2, %p1692_p10 }
  0x2f   : > { %p1695_p0 = pnand %p1694_p13, %p1690_p12 }
  0x31   : > { %1698 = shalt.err (!%p1695_p0)
}
  0x32   : > { %s1699_s28 = scalar_lea.vmem %s136_s19, 160  ;;  %s1787_s3 = smov [#allocation2]  }
  0x33   : > { %p1700_p1 = scmp.ne.s32.totalorder %s136_s19, %s1699_s28  ;;  %s1704_s4 = sshll.u32 %s1787_s3, 4  ;;  %s1705_s4 = int_to_ptr.vmem [resolvable:$false] %s1704_s4 }
  0x34   : > { %s1706_s5 = scalar_lea.vmem %s1705_s4, 320  ;;  %p1707_p11 = scmp.lt.s32.totalorder %s136_s19, %s1705_s4 }
  0x35   : > { %p1702_p6 = pnand %p1700_p1, %p1688_p7  ;;  %p1708_p9 = scmp.lt.s32.totalorder %s1706_s5, %s1699_s28 }
  0x37   : > { %p1703_p3 = pneg %p1702_p6  ;;  %p1709_p4 = por %p1708_p9, %p1707_p11 }
  0x39   : > { %p1710_p8 = pnand %p1709_p4, %p1703_p3 }
  0x3b   : > { %1713 = shalt.err (!%p1710_p8)
}
  0x3c   : > { %1598 = dma.hbm_to_vmem [thread:$0]  (!%p1888_p5), %s1895_s14, 160, %s136_s19, %s124_s20  }
  0x3d   : > { %p2614_p12 = scmp.ne.s32.totalorder %s2609_s17, 0 }
  0x3e   : > { %s1914_s7 = sand.u32 (!%p2614_p12), 1, %s1774_s10   ;;  %p2615_p1 = scmp.ne.s32.totalorder (!%p2614_p12), %s2607_s15, 0 }
  0x3f   : > { %144 = sbr.rel (%p2614_p12) target bundleno = 470 (0x1d6), region = 28  ;;  %s147_s18 = scalar_lea.sflag (!%p2614_p12), [#allocation3], %s1914_s7 }
  0x40   : > { %s1581_s8 = smul.u32 (!%p2614_p12), 10, %s1914_s7 }
  0x42   : > { %s1918_s22 = scalar_lea.vmem (!%p2614_p12), [#allocation2], %s1581_s8 }
  0x44   : > { %1757 = dma.done.wait (%p2615_p1), %s147_s18, 160  }
  0x45   : > { %1759 = vsyncadd (%p2615_p1), %s147_s18, 4294967136  ;;  %p2616_p4 = scmp.eq.s32.totalorder %s1828_s13, 0 }
  0x47   : > { %1761 = dma.done.wait (%p2616_p4), [#allocation6], 576   ;;  %p2617_p6 = pmov %p2616_p4 }
  0x48   : > { %v180_v0 = vlaneseq  ;;  %v1788_v1 = vmov 0   ;;  %v178_v15 = vld [vmem:[%s1918_s22] sm:$0xff]  ;;  %v1789_v36 = vmov 0.0   ;;  %s1582_s15 = smul.u32 40, %s1914_s7  ;;  %s1244_s24 = scalar_lea.sflag [#allocation4], %s1914_s7 }
  0x49   : > { %1763 = vsyncadd (%p2617_p6), [#allocation6], 4294966720  ;;  %946 = vmatprep.mubr.bf16.mxu0 %v1788_v1  ;;  %1027 = vmatprep.mubr.bf16.mxu1 %v1788_v1  ;;  %s1514_s6 = smul.u32 640, %s1828_s13  ;;  %p2618_p3 = scmp.ne.s32.totalorder %s2612_s30, 0 }
  0x4a   : > { %v1930_v2 = vshrl.u32 %v180_v0, 7  ;;  %s2550_s17 = scalar_lea.vmem [#allocation7], %s1582_s15  ;;  %s1791_s13 = smov [#allocation7]  }
  0x4b   : > { %s1258_s14 = sshll.u32 %s2550_s17, 4  ;;  %s2562_s23 = scalar_lea.hbm %s2602_s2, %s1514_s6  ;;  %s1259_s14 = int_to_ptr.vmem [resolvable:$true] %s1258_s14 }
  0x4c   : > { %v1933_v3 = vadd.s32 112, %v1930_v2  ;;  %v1936_v4 = vadd.s32 120, %v1930_v2  ;;  %v1939_v5 = vsub.s32 0, %v1930_v2  ;;  %v203_v6 = vsub.s32 2, %v1930_v2  ;;  %s1714_s25 = scalar_lea.vmem %s1259_s14, 640  ;;  %s1718_s26 = sshll.u32 %s1791_s13, 4  ;;  %s1719_s26 = int_to_ptr.vmem [resolvable:$false] %s1718_s26 }
  0x4d   : > { %v1943_v7 = vsub.s32 1, %v1930_v2  ;;  %v483_v8 = vsub.s32 3, %v1930_v2  ;;  %v211_v9 = vsub.s32 6, %v1930_v2  ;;  %v491_v10 = vsub.s32 7, %v1930_v2  ;;  %p1715_p8 = scmp.ne.s32.totalorder %s1259_s14, %s1714_s25  ;;  %s1720_s27 = scalar_lea.vmem %s1719_s26, 1280 }
  0x4e   : > { %v207_v11 = vsub.s32 4, %v1930_v2  ;;  %v487_v12 = vsub.s32 5, %v1930_v2  ;;  %v1951_v13 = vadd.s32 96, %v1930_v2  ;;  %v1954_v14 = vadd.s32 104, %v1930_v2  ;;  %p1721_p10 = scmp.lt.s32.totalorder %s1259_s14, %s1719_s26  ;;  %p1722_p2 = scmp.lt.s32.totalorder %s1720_s27, %s1714_s25 }
  0x4f   : > { %v1958_v16 = vadd.s32 80, %v1930_v2  ;;  %v1961_v17 = vadd.s32 88, %v1930_v2  ;;  %v1964_v18 = vadd.s32 64, %v1930_v2  ;;  %v1967_v19 = vadd.s32 72, %v1930_v2  ;;  %p1716_p5 = pnand %p1715_p8, %p2618_p3 }
  0x50   : > { %v204_v20 = vrot.slane %v178_v15, %v203_v6  ;;  %v484_v21 = vrot.slane %v178_v15, %v483_v8  ;;  %v212_v22 = vrot.slane %v178_v15, %v211_v9  ;;  %v492_v23 = vrot.slane %v178_v15, %v491_v10  ;;  %p1723_p13 = por %p1722_p2, %p1721_p10 }
  0x51   : > { %v200_v24 = vrot.slane %v178_v15, %v1939_v5  ;;  %v480_v25 = vrot.slane %v178_v15, %v1943_v7  ;;  %v208_v26 = vrot.slane %v178_v15, %v207_v11  ;;  %v488_v27 = vrot.slane %v178_v15, %v487_v12  ;;  %p1717_p7 = pneg %p1716_p5 }
  0x52   : > { %v1972_v28 = vrot.slane %v204_v20, %v1939_v5  ;;  %v1975_v29 = vrot.slane %v484_v21, %v1943_v7  ;;  %v1978_v30 = vrot.slane %v212_v22, %v1939_v5  ;;  %v1981_v31 = vrot.slane %v492_v23, %v1943_v7 }
  0x53   : > { %v1984_v32 = vrot.slane %v200_v24, %v1939_v5  ;;  %v1987_v33 = vrot.slane %v480_v25, %v1943_v7  ;;  %v1990_v34 = vrot.slane %v208_v26, %v1939_v5  ;;  %v1993_v35 = vrot.slane %v488_v27, %v1943_v7  ;;  %p1724_p0 = pnand %p1723_p13, %p1717_p7 }
  0x54   : > { %vm308_vm0 = vcmp.eq.s32.totalorder %v1933_v3, %v1972_v28  ;;  %vm313_vm1 = vcmp.eq.s32.totalorder %v1936_v4, %v1972_v28  ;;  %vm588_vm2 = vcmp.eq.s32.totalorder %v1933_v3, %v1975_v29  ;;  %vm593_vm3 = vcmp.eq.s32.totalorder %v1936_v4, %v1975_v29 }
  0x55   : > { %v1416_v37 = vsel %vm308_vm0, 1.0, %v1789_v36  ;;  %v1421_v38 = vsel %vm313_vm1, 1.0, %v1789_v36  ;;  %v1496_v39 = vsel %vm588_vm2, 1.0, %v1789_v36  ;;  %v1501_v40 = vsel %vm593_vm3, 1.0, %v1789_v36 }
  0x56   : > { %v828_v41 = vsub.f32 %v1416_v37, %v1496_v39  ;;  %v833_v42 = vsub.f32 %v1421_v38, %v1501_v40  ;;  %vm310_vm4 = vcmp.eq.s32.totalorder %v1933_v3, %v1978_v30  ;;  %vm315_vm5 = vcmp.eq.s32.totalorder %v1936_v4, %v1978_v30 }
  0x57   : > { %v1418_v43 = vsel %vm310_vm4, 1.0, %v1789_v36  ;;  %v1423_v44 = vsel %vm315_vm5, 1.0, %v1789_v36  ;;  %vm590_vm6 = vcmp.eq.s32.totalorder %v1933_v3, %v1981_v31  ;;  %vm595_vm7 = vcmp.eq.s32.totalorder %v1936_v4, %v1981_v31 }
  0x58   : > { %v873_v45 = vpack.c.bf16 %v833_v42, %v828_v41  ;;  %v1498_v46 = vsel %vm590_vm6, 1.0, %v1789_v36  ;;  %v1503_v47 = vsel %vm595_vm7, 1.0, %v1789_v36  ;;  %vm307_vm8 = vcmp.eq.s32.totalorder %v1933_v3, %v1984_v32 }
  0x59   : > { %v830_v48 = vsub.f32 %v1418_v43, %v1498_v46  ;;  %v835_v49 = vsub.f32 %v1423_v44, %v1503_v47  ;;  %vm312_vm9 = vcmp.eq.s32.totalorder %v1936_v4, %v1984_v32  ;;  %v1415_v50 = vsel %vm307_vm8, 1.0, %v1789_v36 }
  0x5a   : > { %914 = vmatprep.subr.bf16.mxu0 %v873_v45  ;;  %v1420_v51 = vsel %vm312_vm9, 1.0, %v1789_v36  ;;  %vm587_vm10 = vcmp.eq.s32.totalorder %v1933_v3, %v1987_v33  ;;  %vm592_vm11 = vcmp.eq.s32.totalorder %v1936_v4, %v1987_v33  ;;  %vm309_vm12 = vcmp.eq.s32.totalorder %v1933_v3, %v1990_v34 }
  0x5b   : > { %v875_v52 = vpack.c.bf16 %v835_v49, %v830_v48  ;;  %v1495_v53 = vsel %vm587_vm10, 1.0, %v1789_v36  ;;  %v1500_v54 = vsel %vm592_vm11, 1.0, %v1789_v36  ;;  %vm314_vm13 = vcmp.eq.s32.totalorder %v1936_v4, %v1990_v34 }
  0x5c   : > { %v827_v55 = vsub.f32 %v1415_v50, %v1495_v53  ;;  %v832_v56 = vsub.f32 %v1420_v51, %v1500_v54  ;;  %v1417_v57 = vsel %vm309_vm12, 1.0, %v1789_v36  ;;  %v1422_v58 = vsel %vm314_vm13, 1.0, %v1789_v36 }
  0x5d   : > { %995 = vmatprep.subr.bf16.mxu1 %v875_v52  ;;  %vm589_vm14 = vcmp.eq.s32.totalorder %v1933_v3, %v1993_v35  ;;  %vm594_vm15 = vcmp.eq.s32.totalorder %v1936_v4, %v1993_v35  ;;  %vm298_vm0 = vcmp.eq.s32.totalorder %v1951_v13, %v1972_v28  ;;  %vm303_vm1 = vcmp.eq.s32.totalorder %v1954_v14, %v1972_v28 }
  0x5e   : > { %v872_v59 = vpack.c.bf16 %v832_v56, %v827_v55  ;;  %v1497_v60 = vsel %vm589_vm14, 1.0, %v1789_v36  ;;  %v1502_v61 = vsel %vm594_vm15, 1.0, %v1789_v36  ;;  %v1406_v62 = vsel %vm298_vm0, 1.0, %v1789_v36 }
  0x5f   : > { %v829_v63 = vsub.f32 %v1417_v57, %v1497_v60  ;;  %v834_v0 = vsub.f32 %v1422_v58, %v1502_v61  ;;  %v1411_v6 = vsel %vm303_vm1, 1.0, %v1789_v36  ;;  %vm578_vm2 = vcmp.eq.s32.totalorder %v1951_v13, %v1975_v29 }
  0x60   : > { %915 = vmatpush1.bf16.msra.mxu0 %v872_v59  ;;  %vm583_vm3 = vcmp.eq.s32.totalorder %v1954_v14, %v1975_v29  ;;  %v1486_v8 = vsel %vm578_vm2, 1.0, %v1789_v36  ;;  %vm300_vm4 = vcmp.eq.s32.totalorder %v1951_v13, %v1978_v30  ;;  %vm305_vm5 = vcmp.eq.s32.totalorder %v1954_v14, %v1978_v30 }
  0x61   : > { %v874_v9 = vpack.c.bf16 %v834_v0, %v829_v63  ;;  %v1491_v10 = vsel %vm583_vm3, 1.0, %v1789_v36  ;;  %v818_v11 = vsub.f32 %v1406_v62, %v1486_v8  ;;  %v1408_v12 = vsel %vm300_vm4, 1.0, %v1789_v36 }
  0x62   : > { %v823_v15 = vsub.f32 %v1411_v6, %v1491_v10  ;;  %v1413_v20 = vsel %vm305_vm5, 1.0, %v1789_v36  ;;  %vm580_vm6 = vcmp.eq.s32.totalorder %v1951_v13, %v1981_v31  ;;  %vm585_vm7 = vcmp.eq.s32.totalorder %v1954_v14, %v1981_v31 }
  0x63   : > { %996 = vmatpush1.bf16.msra.mxu1 %v874_v9  ;;  %v1488_v21 = vsel %vm580_vm6, 1.0, %v1789_v36  ;;  %v1493_v22 = vsel %vm585_vm7, 1.0, %v1789_v36  ;;  %vm297_vm8 = vcmp.eq.s32.totalorder %v1951_v13, %v1984_v32  ;;  %vm302_vm9 = vcmp.eq.s32.totalorder %v1954_v14, %v1984_v32 }
  0x64   : > { %v868_v23 = vpack.c.bf16 %v823_v15, %v818_v11  ;;  %v820_v24 = vsub.f32 %v1408_v12, %v1488_v21  ;;  %v825_v25 = vsub.f32 %v1413_v20, %v1493_v22  ;;  %v1405_v26 = vsel %vm297_vm8, 1.0, %v1789_v36 }
  0x65   : > { %v1410_v27 = vsel %vm302_vm9, 1.0, %v1789_v36  ;;  %vm577_vm10 = vcmp.eq.s32.totalorder %v1951_v13, %v1987_v33  ;;  %vm582_vm11 = vcmp.eq.s32.totalorder %v1954_v14, %v1987_v33  ;;  %vm299_vm12 = vcmp.eq.s32.totalorder %v1951_v13, %v1990_v34 }
  0x66   : > { %916 = vmatprep.subr.bf16.mxu0 %v868_v23  ;;  %v870_v37 = vpack.c.bf16 %v825_v25, %v820_v24  ;;  %v1485_v38 = vsel %vm577_vm10, 1.0, %v1789_v36  ;;  %v1490_v39 = vsel %vm582_vm11, 1.0, %v1789_v36  ;;  %vm304_vm13 = vcmp.eq.s32.totalorder %v1954_v14, %v1990_v34 }
  0x67   : > { %v817_v40 = vsub.f32 %v1405_v26, %v1485_v38  ;;  %v822_v41 = vsub.f32 %v1410_v27, %v1490_v39  ;;  %v1407_v42 = vsel %vm299_vm12, 1.0, %v1789_v36  ;;  %v1412_v43 = vsel %vm304_vm13, 1.0, %v1789_v36 }
  0x68   : > { %997 = vmatprep.subr.bf16.mxu1 %v870_v37  ;;  %vm579_vm14 = vcmp.eq.s32.totalorder %v1951_v13, %v1993_v35  ;;  %vm584_vm15 = vcmp.eq.s32.totalorder %v1954_v14, %v1993_v35  ;;  %vm288_vm0 = vcmp.eq.s32.totalorder %v1958_v16, %v1972_v28  ;;  %vm293_vm1 = vcmp.eq.s32.totalorder %v1961_v17, %v1972_v28 }
  0x69   : > { %v867_v44 = vpack.c.bf16 %v822_v41, %v817_v40  ;;  %v1487_v45 = vsel %vm579_vm14, 1.0, %v1789_v36  ;;  %v1492_v46 = vsel %vm584_vm15, 1.0, %v1789_v36  ;;  %v1396_v47 = vsel %vm288_vm0, 1.0, %v1789_v36 }
  0x6a   : > { %v819_v48 = vsub.f32 %v1407_v42, %v1487_v45  ;;  %v824_v49 = vsub.f32 %v1412_v43, %v1492_v46  ;;  %v1401_v50 = vsel %vm293_vm1, 1.0, %v1789_v36  ;;  %vm568_vm2 = vcmp.eq.s32.totalorder %v1958_v16, %v1975_v29 }
  0x6b   : > { %917 = vmatpush1.bf16.msra.mxu0 %v867_v44  ;;  %vm573_vm3 = vcmp.eq.s32.totalorder %v1961_v17, %v1975_v29  ;;  %v1476_v51 = vsel %vm568_vm2, 1.0, %v1789_v36  ;;  %vm290_vm4 = vcmp.eq.s32.totalorder %v1958_v16, %v1978_v30  ;;  %vm295_vm5 = vcmp.eq.s32.totalorder %v1961_v17, %v1978_v30 }
  0x6c   : > { %v869_v52 = vpack.c.bf16 %v824_v49, %v819_v48  ;;  %v1481_v53 = vsel %vm573_vm3, 1.0, %v1789_v36  ;;  %v808_v54 = vsub.f32 %v1396_v47, %v1476_v51  ;;  %v1398_v55 = vsel %vm290_vm4, 1.0, %v1789_v36 }
  0x6d   : > { %v813_v56 = vsub.f32 %v1401_v50, %v1481_v53  ;;  %v1403_v57 = vsel %vm295_vm5, 1.0, %v1789_v36  ;;  %vm570_vm6 = vcmp.eq.s32.totalorder %v1958_v16, %v1981_v31  ;;  %vm575_vm7 = vcmp.eq.s32.totalorder %v1961_v17, %v1981_v31 }
  0x6e   : > { %998 = vmatpush1.bf16.msra.mxu1 %v869_v52  ;;  %v1478_v58 = vsel %vm570_vm6, 1.0, %v1789_v36  ;;  %v1483_v59 = vsel %vm575_vm7, 1.0, %v1789_v36  ;;  %vm287_vm8 = vcmp.eq.s32.totalorder %v1958_v16, %v1984_v32  ;;  %vm292_vm9 = vcmp.eq.s32.totalorder %v1961_v17, %v1984_v32 }
  0x6f   : > { %v863_v60 = vpack.c.bf16 %v813_v56, %v808_v54  ;;  %v810_v61 = vsub.f32 %v1398_v55, %v1478_v58  ;;  %v815_v62 = vsub.f32 %v1403_v57, %v1483_v59  ;;  %v1395_v63 = vsel %vm287_vm8, 1.0, %v1789_v36 }
  0x70   : > { %v1400_v0 = vsel %vm292_vm9, 1.0, %v1789_v36  ;;  %vm567_vm10 = vcmp.eq.s32.totalorder %v1958_v16, %v1987_v33  ;;  %vm572_vm11 = vcmp.eq.s32.totalorder %v1961_v17, %v1987_v33  ;;  %vm289_vm12 = vcmp.eq.s32.totalorder %v1958_v16, %v1990_v34 }
  0x71   : > { %918 = vmatprep.subr.bf16.mxu0 %v863_v60  ;;  %v865_v6 = vpack.c.bf16 %v815_v62, %v810_v61  ;;  %v1475_v8 = vsel %vm567_vm10, 1.0, %v1789_v36  ;;  %v1480_v9 = vsel %vm572_vm11, 1.0, %v1789_v36  ;;  %vm294_vm13 = vcmp.eq.s32.totalorder %v1961_v17, %v1990_v34 }
  0x72   : > { %v807_v10 = vsub.f32 %v1395_v63, %v1475_v8  ;;  %v812_v11 = vsub.f32 %v1400_v0, %v1480_v9  ;;  %v1397_v12 = vsel %vm289_vm12, 1.0, %v1789_v36  ;;  %v1402_v15 = vsel %vm294_vm13, 1.0, %v1789_v36 }
  0x73   : > { %999 = vmatprep.subr.bf16.mxu1 %v865_v6  ;;  %vm569_vm14 = vcmp.eq.s32.totalorder %v1958_v16, %v1993_v35  ;;  %vm574_vm15 = vcmp.eq.s32.totalorder %v1961_v17, %v1993_v35  ;;  %vm278_vm0 = vcmp.eq.s32.totalorder %v1964_v18, %v1972_v28  ;;  %vm283_vm1 = vcmp.eq.s32.totalorder %v1967_v19, %v1972_v28 }
  0x74   : > { %v862_v20 = vpack.c.bf16 %v812_v11, %v807_v10  ;;  %v1477_v21 = vsel %vm569_vm14, 1.0, %v1789_v36  ;;  %v1482_v22 = vsel %vm574_vm15, 1.0, %v1789_v36  ;;  %v1386_v23 = vsel %vm278_vm0, 1.0, %v1789_v36 }
  0x75   : > { %v809_v24 = vsub.f32 %v1397_v12, %v1477_v21  ;;  %v814_v25 = vsub.f32 %v1402_v15, %v1482_v22  ;;  %v1391_v26 = vsel %vm283_vm1, 1.0, %v1789_v36  ;;  %vm558_vm2 = vcmp.eq.s32.totalorder %v1964_v18, %v1975_v29 }
  0x76   : > { %919 = vmatpush1.bf16.msra.mxu0 %v862_v20  ;;  %vm563_vm3 = vcmp.eq.s32.totalorder %v1967_v19, %v1975_v29  ;;  %v1466_v27 = vsel %vm558_vm2, 1.0, %v1789_v36  ;;  %vm280_vm4 = vcmp.eq.s32.totalorder %v1964_v18, %v1978_v30  ;;  %vm285_vm5 = vcmp.eq.s32.totalorder %v1967_v19, %v1978_v30 }
  0x77   : > { %v864_v37 = vpack.c.bf16 %v814_v25, %v809_v24  ;;  %v1471_v38 = vsel %vm563_vm3, 1.0, %v1789_v36  ;;  %v798_v39 = vsub.f32 %v1386_v23, %v1466_v27  ;;  %v1388_v40 = vsel %vm280_vm4, 1.0, %v1789_v36 }
  0x78   : > { %v803_v41 = vsub.f32 %v1391_v26, %v1471_v38  ;;  %v1393_v42 = vsel %vm285_vm5, 1.0, %v1789_v36  ;;  %vm560_vm6 = vcmp.eq.s32.totalorder %v1964_v18, %v1981_v31  ;;  %vm565_vm7 = vcmp.eq.s32.totalorder %v1967_v19, %v1981_v31 }
  0x79   : > { %1000 = vmatpush1.bf16.msra.mxu1 %v864_v37  ;;  %v1468_v43 = vsel %vm560_vm6, 1.0, %v1789_v36  ;;  %v1473_v44 = vsel %vm565_vm7, 1.0, %v1789_v36  ;;  %vm277_vm8 = vcmp.eq.s32.totalorder %v1964_v18, %v1984_v32  ;;  %vm282_vm9 = vcmp.eq.s32.totalorder %v1967_v19, %v1984_v32 }
  0x7a   : > { %v858_v45 = vpack.c.bf16 %v803_v41, %v798_v39  ;;  %v800_v46 = vsub.f32 %v1388_v40, %v1468_v43  ;;  %v805_v47 = vsub.f32 %v1393_v42, %v1473_v44  ;;  %v1385_v48 = vsel %vm277_vm8, 1.0, %v1789_v36 }
  0x7b   : > { %v1390_v49 = vsel %vm282_vm9, 1.0, %v1789_v36  ;;  %vm557_vm10 = vcmp.eq.s32.totalorder %v1964_v18, %v1987_v33  ;;  %vm562_vm11 = vcmp.eq.s32.totalorder %v1967_v19, %v1987_v33  ;;  %vm279_vm12 = vcmp.eq.s32.totalorder %v1964_v18, %v1990_v34 }
  0x7c   : > { %920 = vmatprep.subr.bf16.mxu0 %v858_v45  ;;  %v860_v50 = vpack.c.bf16 %v805_v47, %v800_v46  ;;  %v1465_v51 = vsel %vm557_vm10, 1.0, %v1789_v36  ;;  %v1470_v52 = vsel %vm562_vm11, 1.0, %v1789_v36  ;;  %vm284_vm13 = vcmp.eq.s32.totalorder %v1967_v19, %v1990_v34 }
  0x7d   : > { %v797_v53 = vsub.f32 %v1385_v48, %v1465_v51  ;;  %v802_v54 = vsub.f32 %v1390_v49, %v1470_v52  ;;  %v1387_v55 = vsel %vm279_vm12, 1.0, %v1789_v36  ;;  %v1392_v56 = vsel %vm284_vm13, 1.0, %v1789_v36 }
  0x7e   : > { %1001 = vmatprep.subr.bf16.mxu1 %v860_v50  ;;  %vm559_vm14 = vcmp.eq.s32.totalorder %v1964_v18, %v1993_v35  ;;  %vm564_vm15 = vcmp.eq.s32.totalorder %v1967_v19, %v1993_v35  ;;  %v2186_v57 = vadd.s32 48, %v1930_v2  ;;  %v2189_v58 = vadd.s32 56, %v1930_v2 }
  0x7f   : > { %v857_v59 = vpack.c.bf16 %v802_v54, %v797_v53  ;;  %v1467_v60 = vsel %vm559_vm14, 1.0, %v1789_v36  ;;  %v1472_v61 = vsel %vm564_vm15, 1.0, %v1789_v36  ;;  %v2194_v62 = vadd.s32 32, %v1930_v2 }
  0x80   : > { %v799_v63 = vsub.f32 %v1387_v55, %v1467_v60  ;;  %v804_v0 = vsub.f32 %v1392_v56, %v1472_v61  ;;  %vm268_vm0 = vcmp.eq.s32.totalorder %v2186_v57, %v1972_v28  ;;  %vm273_vm1 = vcmp.eq.s32.totalorder %v2189_v58, %v1972_v28 }
  0x81   : > { %921 = vmatpush1.bf16.msra.mxu0 %v857_v59  ;;  %v1376_v6 = vsel %vm268_vm0, 1.0, %v1789_v36  ;;  %v1381_v8 = vsel %vm273_vm1, 1.0, %v1789_v36  ;;  %vm548_vm2 = vcmp.eq.s32.totalorder %v2186_v57, %v1975_v29  ;;  %vm553_vm3 = vcmp.eq.s32.totalorder %v2189_v58, %v1975_v29 }
  0x82   : > { %v859_v9 = vpack.c.bf16 %v804_v0, %v799_v63  ;;  %v1456_v10 = vsel %vm548_vm2, 1.0, %v1789_v36  ;;  %v1461_v11 = vsel %vm553_vm3, 1.0, %v1789_v36  ;;  %vm270_vm4 = vcmp.eq.s32.totalorder %v2186_v57, %v1978_v30 }
  0x83   : > { %v788_v12 = vsub.f32 %v1376_v6, %v1456_v10  ;;  %v793_v15 = vsub.f32 %v1381_v8, %v1461_v11  ;;  %vm275_vm5 = vcmp.eq.s32.totalorder %v2189_v58, %v1978_v30  ;;  %v1378_v20 = vsel %vm270_vm4, 1.0, %v1789_v36 }
  0x84   : > { %1002 = vmatpush1.bf16.msra.mxu1 %v859_v9  ;;  %v1383_v21 = vsel %vm275_vm5, 1.0, %v1789_v36  ;;  %vm550_vm6 = vcmp.eq.s32.totalorder %v2186_v57, %v1981_v31  ;;  %vm555_vm7 = vcmp.eq.s32.totalorder %v2189_v58, %v1981_v31  ;;  %vm267_vm8 = vcmp.eq.s32.totalorder %v2186_v57, %v1984_v32 }
  0x85   : > { %v853_v22 = vpack.c.bf16 %v793_v15, %v788_v12  ;;  %v1458_v23 = vsel %vm550_vm6, 1.0, %v1789_v36  ;;  %v1463_v24 = vsel %vm555_vm7, 1.0, %v1789_v36  ;;  %vm272_vm9 = vcmp.eq.s32.totalorder %v2189_v58, %v1984_v32 }
  0x86   : > { %v790_v25 = vsub.f32 %v1378_v20, %v1458_v23  ;;  %v795_v26 = vsub.f32 %v1383_v21, %v1463_v24  ;;  %v1375_v27 = vsel %vm267_vm8, 1.0, %v1789_v36  ;;  %v1380_v37 = vsel %vm272_vm9, 1.0, %v1789_v36 }
  0x87   : > { %922 = vmatprep.subr.bf16.mxu0 %v853_v22  ;;  %vm547_vm10 = vcmp.eq.s32.totalorder %v2186_v57, %v1987_v33  ;;  %vm552_vm11 = vcmp.eq.s32.totalorder %v2189_v58, %v1987_v33  ;;  %vm269_vm12 = vcmp.eq.s32.totalorder %v2186_v57, %v1990_v34  ;;  %vm274_vm13 = vcmp.eq.s32.totalorder %v2189_v58, %v1990_v34 }
  0x88   : > { %v855_v38 = vpack.c.bf16 %v795_v26, %v790_v25  ;;  %v1455_v39 = vsel %vm547_vm10, 1.0, %v1789_v36  ;;  %v1460_v40 = vsel %vm552_vm11, 1.0, %v1789_v36  ;;  %v1377_v41 = vsel %vm269_vm12, 1.0, %v1789_v36 }
  0x89   : > { %v787_v42 = vsub.f32 %v1375_v27, %v1455_v39  ;;  %v792_v43 = vsub.f32 %v1380_v37, %v1460_v40  ;;  %v1382_v44 = vsel %vm274_vm13, 1.0, %v1789_v36  ;;  %vm549_vm14 = vcmp.eq.s32.totalorder %v2186_v57, %v1993_v35 }
  0x8a   : > { %1003 = vmatprep.subr.bf16.mxu1 %v855_v38  ;;  %vm554_vm15 = vcmp.eq.s32.totalorder %v2189_v58, %v1993_v35  ;;  %v1457_v45 = vsel %vm549_vm14, 1.0, %v1789_v36  ;;  %v2244_v46 = vadd.s32 40, %v1930_v2  ;;  %vm258_vm0 = vcmp.eq.s32.totalorder %v2194_v62, %v1972_v28 }
  0x8b   : > { %v852_v47 = vpack.c.bf16 %v792_v43, %v787_v42  ;;  %v1462_v48 = vsel %vm554_vm15, 1.0, %v1789_v36  ;;  %v789_v49 = vsub.f32 %v1377_v41, %v1457_v45  ;;  %v1366_v50 = vsel %vm258_vm0, 1.0, %v1789_v36 }
  0x8c   : > { %v794_v51 = vsub.f32 %v1382_v44, %v1462_v48  ;;  %vm263_vm1 = vcmp.eq.s32.totalorder %v2244_v46, %v1972_v28  ;;  %vm538_vm2 = vcmp.eq.s32.totalorder %v2194_v62, %v1975_v29  ;;  %vm543_vm3 = vcmp.eq.s32.totalorder %v2244_v46, %v1975_v29 }
  0x8d   : > { %923 = vmatpush1.bf16.msra.mxu0 %v852_v47  ;;  %v1371_v52 = vsel %vm263_vm1, 1.0, %v1789_v36  ;;  %v1446_v53 = vsel %vm538_vm2, 1.0, %v1789_v36  ;;  %v1451_v54 = vsel %vm543_vm3, 1.0, %v1789_v36  ;;  %vm260_vm4 = vcmp.eq.s32.totalorder %v2194_v62, %v1978_v30 }
  0x8e   : > { %v854_v55 = vpack.c.bf16 %v794_v51, %v789_v49  ;;  %v778_v56 = vsub.f32 %v1366_v50, %v1446_v53  ;;  %v783_v59 = vsub.f32 %v1371_v52, %v1451_v54  ;;  %vm265_vm5 = vcmp.eq.s32.totalorder %v2244_v46, %v1978_v30 }
  0x8f   : > { %v1368_v60 = vsel %vm260_vm4, 1.0, %v1789_v36  ;;  %v1373_v61 = vsel %vm265_vm5, 1.0, %v1789_v36  ;;  %vm540_vm6 = vcmp.eq.s32.totalorder %v2194_v62, %v1981_v31  ;;  %vm545_vm7 = vcmp.eq.s32.totalorder %v2244_v46, %v1981_v31 }
  0x90   : > { %1004 = vmatpush1.bf16.msra.mxu1 %v854_v55  ;;  %v848_v63 = vpack.c.bf16 %v783_v59, %v778_v56  ;;  %v1448_v0 = vsel %vm540_vm6, 1.0, %v1789_v36  ;;  %v1453_v6 = vsel %vm545_vm7, 1.0, %v1789_v36  ;;  %vm257_vm8 = vcmp.eq.s32.totalorder %v2194_v62, %v1984_v32 }
  0x91   : > { %v780_v8 = vsub.f32 %v1368_v60, %v1448_v0  ;;  %v785_v9 = vsub.f32 %v1373_v61, %v1453_v6  ;;  %vm262_vm9 = vcmp.eq.s32.totalorder %v2244_v46, %v1984_v32  ;;  %v1365_v10 = vsel %vm257_vm8, 1.0, %v1789_v36 }
  0x92   : > { %924 = vmatprep.subr.bf16.mxu0 %v848_v63  ;;  %v1370_v11 = vsel %vm262_vm9, 1.0, %v1789_v36  ;;  %vm537_vm10 = vcmp.eq.s32.totalorder %v2194_v62, %v1987_v33  ;;  %vm542_vm11 = vcmp.eq.s32.totalorder %v2244_v46, %v1987_v33  ;;  %vm259_vm12 = vcmp.eq.s32.totalorder %v2194_v62, %v1990_v34 }
  0x93   : > { %v850_v12 = vpack.c.bf16 %v785_v9, %v780_v8  ;;  %v1445_v15 = vsel %vm537_vm10, 1.0, %v1789_v36  ;;  %v1450_v20 = vsel %vm542_vm11, 1.0, %v1789_v36  ;;  %vm264_vm13 = vcmp.eq.s32.totalorder %v2244_v46, %v1990_v34 }
  0x94   : > { %v777_v21 = vsub.f32 %v1365_v10, %v1445_v15  ;;  %v782_v22 = vsub.f32 %v1370_v11, %v1450_v20  ;;  %v1367_v23 = vsel %vm259_vm12, 1.0, %v1789_v36  ;;  %v1372_v24 = vsel %vm264_vm13, 1.0, %v1789_v36 }
  0x95   : > { %1005 = vmatprep.subr.bf16.mxu1 %v850_v12  ;;  %vm539_vm14 = vcmp.eq.s32.totalorder %v2194_v62, %v1993_v35  ;;  %vm544_vm15 = vcmp.eq.s32.totalorder %v2244_v46, %v1993_v35  ;;  %v2294_v25 = vadd.s32 16, %v1930_v2  ;;  %v2297_v26 = vadd.s32 24, %v1930_v2 }
  0x96   : > { %v847_v27 = vpack.c.bf16 %v782_v22, %v777_v21  ;;  %v1447_v37 = vsel %vm539_vm14, 1.0, %v1789_v36  ;;  %v1452_v38 = vsel %vm544_vm15, 1.0, %v1789_v36  ;;  %v2302_v39 = vadd.s32 8, %v1930_v2 }
  0x97   : > { %v779_v40 = vsub.f32 %v1367_v23, %v1447_v37  ;;  %v784_v41 = vsub.f32 %v1372_v24, %v1452_v38  ;;  %vm248_vm0 = vcmp.eq.s32.totalorder %v2294_v25, %v1972_v28  ;;  %vm253_vm1 = vcmp.eq.s32.totalorder %v2297_v26, %v1972_v28 }
  0x98   : > { %925 = vmatpush1.bf16.msra.mxu0 %v847_v27  ;;  %v1356_v42 = vsel %vm248_vm0, 1.0, %v1789_v36  ;;  %v1361_v43 = vsel %vm253_vm1, 1.0, %v1789_v36  ;;  %vm528_vm2 = vcmp.eq.s32.totalorder %v2294_v25, %v1975_v29  ;;  %vm533_vm3 = vcmp.eq.s32.totalorder %v2297_v26, %v1975_v29 }
  0x99   : > { %v849_v44 = vpack.c.bf16 %v784_v41, %v779_v40  ;;  %v1436_v45 = vsel %vm528_vm2, 1.0, %v1789_v36  ;;  %v1441_v47 = vsel %vm533_vm3, 1.0, %v1789_v36  ;;  %vm250_vm4 = vcmp.eq.s32.totalorder %v2294_v25, %v1978_v30 }
  0x9a   : > { %v768_v48 = vsub.f32 %v1356_v42, %v1436_v45  ;;  %v773_v49 = vsub.f32 %v1361_v43, %v1441_v47  ;;  %vm255_vm5 = vcmp.eq.s32.totalorder %v2297_v26, %v1978_v30  ;;  %v1358_v50 = vsel %vm250_vm4, 1.0, %v1789_v36 }
  0x9b   : > { %1006 = vmatpush1.bf16.msra.mxu1 %v849_v44  ;;  %v1363_v51 = vsel %vm255_vm5, 1.0, %v1789_v36  ;;  %vm530_vm6 = vcmp.eq.s32.totalorder %v2294_v25, %v1981_v31  ;;  %vm535_vm7 = vcmp.eq.s32.totalorder %v2297_v26, %v1981_v31  ;;  %vm247_vm8 = vcmp.eq.s32.totalorder %v2294_v25, %v1984_v32 }
  0x9c   : > { %v843_v52 = vpack.c.bf16 %v773_v49, %v768_v48  ;;  %v1438_v53 = vsel %vm530_vm6, 1.0, %v1789_v36  ;;  %v1443_v54 = vsel %vm535_vm7, 1.0, %v1789_v36  ;;  %vm252_vm9 = vcmp.eq.s32.totalorder %v2297_v26, %v1984_v32 }
  0x9d   : > { %v770_v55 = vsub.f32 %v1358_v50, %v1438_v53  ;;  %v775_v56 = vsub.f32 %v1363_v51, %v1443_v54  ;;  %v1355_v59 = vsel %vm247_vm8, 1.0, %v1789_v36  ;;  %v1360_v60 = vsel %vm252_vm9, 1.0, %v1789_v36 }
  0x9e   : > { %926 = vmatprep.subr.bf16.mxu0 %v843_v52  ;;  %vm527_vm10 = vcmp.eq.s32.totalorder %v2294_v25, %v1987_v33  ;;  %vm532_vm11 = vcmp.eq.s32.totalorder %v2297_v26, %v1987_v33  ;;  %vm249_vm12 = vcmp.eq.s32.totalorder %v2294_v25, %v1990_v34  ;;  %vm254_vm13 = vcmp.eq.s32.totalorder %v2297_v26, %v1990_v34 }
  0x9f   : > { %v845_v61 = vpack.c.bf16 %v775_v56, %v770_v55  ;;  %v1435_v63 = vsel %vm527_vm10, 1.0, %v1789_v36  ;;  %v1440_v0 = vsel %vm532_vm11, 1.0, %v1789_v36  ;;  %v1357_v6 = vsel %vm249_vm12, 1.0, %v1789_v36 }
  0xa0   : > { %v767_v8 = vsub.f32 %v1355_v59, %v1435_v63  ;;  %v772_v9 = vsub.f32 %v1360_v60, %v1440_v0  ;;  %v1362_v10 = vsel %vm254_vm13, 1.0, %v1789_v36  ;;  %vm529_vm14 = vcmp.eq.s32.totalorder %v2294_v25, %v1993_v35 }
  0xa1   : > { %1007 = vmatprep.subr.bf16.mxu1 %v845_v61  ;;  %vm534_vm15 = vcmp.eq.s32.totalorder %v2297_v26, %v1993_v35  ;;  %v1437_v11 = vsel %vm529_vm14, 1.0, %v1789_v36  ;;  %vm238_vm0 = vcmp.eq.s32.totalorder %v1930_v2, %v1972_v28  ;;  %vm243_vm1 = vcmp.eq.s32.totalorder %v2302_v39, %v1972_v28  ;;  %v2403_v61 = vld [vmem:[#allocation5] sm:$0xff]  }
  0xa2   : > { %v842_v12 = vpack.c.bf16 %v772_v9, %v767_v8  ;;  %v1442_v15 = vsel %vm534_vm15, 1.0, %v1789_v36  ;;  %v769_v20 = vsub.f32 %v1357_v6, %v1437_v11  ;;  %v1346_v21 = vsel %vm238_vm0, 1.0, %v1789_v36 }
  0xa3   : > { %v774_v22 = vsub.f32 %v1362_v10, %v1442_v15  ;;  %v1351_v23 = vsel %vm243_vm1, 1.0, %v1789_v36  ;;  %vm518_vm2 = vcmp.eq.s32.totalorder %v1930_v2, %v1975_v29  ;;  %vm523_vm3 = vcmp.eq.s32.totalorder %v2302_v39, %v1975_v29 }
  0xa4   : > { %927 = vmatpush1.bf16.msra.mxu0 %v842_v12  ;;  %v1426_v24 = vsel %vm518_vm2, 1.0, %v1789_v36  ;;  %v1431_v28 = vsel %vm523_vm3, 1.0, %v1789_v36  ;;  %vm240_vm4 = vcmp.eq.s32.totalorder %v1930_v2, %v1978_v30  ;;  %vm245_vm5 = vcmp.eq.s32.totalorder %v2302_v39, %v1978_v30 }
  0xa5   : > { %v844_v27 = vpack.c.bf16 %v774_v22, %v769_v20  ;;  %v758_v37 = vsub.f32 %v1346_v21, %v1426_v24  ;;  %v763_v38 = vsub.f32 %v1351_v23, %v1431_v28  ;;  %v1348_v40 = vsel %vm240_vm4, 1.0, %v1789_v36 }
  0xa6   : > { %v1353_v41 = vsel %vm245_vm5, 1.0, %v1789_v36  ;;  %vm520_vm6 = vcmp.eq.s32.totalorder %v1930_v2, %v1981_v31  ;;  %vm525_vm7 = vcmp.eq.s32.totalorder %v2302_v39, %v1981_v31  ;;  %vm237_vm8 = vcmp.eq.s32.totalorder %v1930_v2, %v1984_v32  ;;  %v179_v31 = vld [vmem:[%s1918_s22 + $0x8] sm:$0x3] }
  0xa7   : > { %1008 = vmatpush1.bf16.msra.mxu1 %v844_v27  ;;  %v838_v29 = vpack.c.bf16 %v763_v38, %v758_v37  ;;  %v1428_v30 = vsel %vm520_vm6, 1.0, %v1789_v36  ;;  %v1433_v42 = vsel %vm525_vm7, 1.0, %v1789_v36  ;;  %vm242_vm9 = vcmp.eq.s32.totalorder %v2302_v39, %v1984_v32 }
  0xa8   : > { %v760_v43 = vsub.f32 %v1348_v40, %v1428_v30  ;;  %v765_v44 = vsub.f32 %v1353_v41, %v1433_v42  ;;  %v1345_v45 = vsel %vm237_vm8, 1.0, %v1789_v36  ;;  %v1350_v47 = vsel %vm242_vm9, 1.0, %v1789_v36 }
  0xa9   : > { %928 = vmatprep.subr.bf16.mxu0 %v838_v29  ;;  %vm517_vm10 = vcmp.eq.s32.totalorder %v1930_v2, %v1987_v33  ;;  %vm522_vm11 = vcmp.eq.s32.totalorder %v2302_v39, %v1987_v33  ;;  %vm239_vm12 = vcmp.eq.s32.totalorder %v1930_v2, %v1990_v34  ;;  %vm244_vm13 = vcmp.eq.s32.totalorder %v2302_v39, %v1990_v34 }
  0xaa   : > { %v840_v32 = vpack.c.bf16 %v765_v44, %v760_v43  ;;  %v1425_v48 = vsel %vm517_vm10, 1.0, %v1789_v36  ;;  %v1430_v49 = vsel %vm522_vm11, 1.0, %v1789_v36  ;;  %v1347_v50 = vsel %vm239_vm12, 1.0, %v1789_v36 }
  0xab   : > { %v757_v51 = vsub.f32 %v1345_v45, %v1425_v48  ;;  %v762_v52 = vsub.f32 %v1350_v47, %v1430_v49  ;;  %v1352_v53 = vsel %vm244_vm13, 1.0, %v1789_v36  ;;  %vm519_vm14 = vcmp.eq.s32.totalorder %v1930_v2, %v1993_v35 }
  0xac   : > { %1009 = vmatprep.subr.bf16.mxu1 %v840_v32  ;;  %vm524_vm15 = vcmp.eq.s32.totalorder %v2302_v39, %v1993_v35  ;;  %v1427_v33 = vsel %vm519_vm14, 1.0, %v1789_v36  ;;  %v216_v34 = vrot.slane %v179_v31, %v1939_v5  ;;  %v496_v54 = vrot.slane %v179_v31, %v1943_v7 }
  0xad   : > { %v837_v55 = vpack.c.bf16 %v762_v52, %v757_v51  ;;  %v1432_v56 = vsel %vm524_vm15, 1.0, %v1789_v36  ;;  %v759_v59 = vsub.f32 %v1347_v50, %v1427_v33 }
  0xae   : > { %v764_v60 = vsub.f32 %v1352_v53, %v1432_v56  ;;  %v2406_v63 = vrot.slane %v216_v34, %v1939_v5  ;;  %v2409_v0 = vrot.slane %v496_v54, %v1943_v7 }
  0xaf   : > { %929 = vmatpush1.bf16.msra.mxu0 %v837_v55 }
  0xb0   : > { %v839_v35 = vpack.c.bf16 %v764_v60, %v759_v59  ;;  %1528 = vmatprep.subr.bf16.mxu0 %v1789_v36  ;;  %vm311_vm0 = vcmp.eq.s32.totalorder %v1933_v3, %v2406_v63  ;;  %vm316_vm1 = vcmp.eq.s32.totalorder %v1936_v4, %v2406_v63  ;;  %vm591_vm2 = vcmp.eq.s32.totalorder %v1933_v3, %v2409_v0 }
  0xb1   : > { %v1419_v6 = vsel %vm311_vm0, 1.0, %v1789_v36  ;;  %v1424_v5 = vsel %vm316_vm1, 1.0, %v1789_v36  ;;  %vm596_vm3 = vcmp.eq.s32.totalorder %v1936_v4, %v2409_v0  ;;  %v1499_v7 = vsel %vm591_vm2, 1.0, %v1789_v36 }
  0xb2   : > { %1010 = vmatpush1.bf16.msra.mxu1 %v839_v35  ;;  %947 = vmatmul.mubr.bf16.vlgmr.msra.gmra.mxu0 %v2403_v61  ;;  %v1504_v8 = vsel %vm596_vm3, 1.0, %v1789_v36  ;;  %v831_v9 = vsub.f32 %v1419_v6, %v1499_v7  ;;  %vm301_vm4 = vcmp.eq.s32.totalorder %v1951_v13, %v2406_v63  ;;  %vm306_vm5 = vcmp.eq.s32.totalorder %v1954_v14, %v2406_v63 }
  0xb3   : > { %v836_v3 = vsub.f32 %v1424_v5, %v1504_v8  ;;  %v1409_v10 = vsel %vm301_vm4, 1.0, %v1789_v36  ;;  %v1414_v11 = vsel %vm306_vm5, 1.0, %v1789_v36  ;;  %vm581_vm6 = vcmp.eq.s32.totalorder %v1951_v13, %v2409_v0  ;;  %956 = vmatprep.mubr.bf16.mxu0 %v1788_v1  ;;  %1564 = vmatprep.subr.bf16.mxu1 %v1789_v36 }
  0xb4   : > { %vm586_vm7 = vcmp.eq.s32.totalorder %v1954_v14, %v2409_v0  ;;  %v1489_v4 = vsel %vm581_vm6, 1.0, %v1789_v36  ;;  %vm291_vm8 = vcmp.eq.s32.totalorder %v1958_v16, %v2406_v63  ;;  %vm296_vm9 = vcmp.eq.s32.totalorder %v1961_v17, %v2406_v63  ;;  %v2446_v14 = vld [vmem:[#allocation5 + $0x8] sm:$0xff]  }
  0xb5   : > { %1028 = vmatmul.mubr.bf16.vlgmr.msra.gmra.mxu1 %v2403_v61  ;;  %v876_v12 = vpack.c.bf16 %v836_v3, %v831_v9  ;;  %v1494_v13 = vsel %vm586_vm7, 1.0, %v1789_v36  ;;  %v821_v15 = vsub.f32 %v1409_v10, %v1489_v4  ;;  %v1399_v20 = vsel %vm291_vm8, 1.0, %v1789_v36 }
  0xb6   : > { %v826_v21 = vsub.f32 %v1414_v11, %v1494_v13  ;;  %1037 = vmatprep.mubr.bf16.mxu1 %v1788_v1  ;;  %v1404_v22 = vsel %vm296_vm9, 1.0, %v1789_v36  ;;  %vm571_vm10 = vcmp.eq.s32.totalorder %v1958_v16, %v2409_v0  ;;  %vm576_vm11 = vcmp.eq.s32.totalorder %v1961_v17, %v2409_v0 }
  0xb7   : > { %1529 = vmatpush3.bf16.msra.mxu0 %v876_v12  ;;  %v1479_v23 = vsel %vm571_vm10, 1.0, %v1789_v36  ;;  %v1484_v24 = vsel %vm576_vm11, 1.0, %v1789_v36  ;;  %1572 = vmatpush3.bf16.msra.mxu1 %v876_v12  ;;  %vm281_vm12 = vcmp.eq.s32.totalorder %v1964_v18, %v2406_v63  ;;  %vm286_vm13 = vcmp.eq.s32.totalorder %v1967_v19, %v2406_v63 }
  0xb8   : > { %1530 = vmatprep.subr.bf16.mxu0 %v1789_v36  ;;  %v871_v28 = vpack.c.bf16 %v826_v21, %v821_v15  ;;  %v811_v27 = vsub.f32 %v1399_v20, %v1479_v23  ;;  %v816_v16 = vsub.f32 %v1404_v22, %v1484_v24  ;;  %v1389_v37 = vsel %vm281_vm12, 1.0, %v1789_v36  ;;  %1565 = vmatprep.subr.bf16.mxu1 %v1789_v36 }
  0xb9   : > { %v1394_v17 = vsel %vm286_vm13, 1.0, %v1789_v36  ;;  %vm561_vm14 = vcmp.eq.s32.totalorder %v1964_v18, %v2409_v0  ;;  %vm566_vm15 = vcmp.eq.s32.totalorder %v1967_v19, %v2409_v0  ;;  %vm271_vm0 = vcmp.eq.s32.totalorder %v2186_v57, %v2406_v63 }
  0xba   : > { %957 = vmatmul.mubr.bf16.gmra.mxu0 %v2446_v14  ;;  %v866_v38 = vpack.c.bf16 %v816_v16, %v811_v27  ;;  %v1469_v40 = vsel %vm561_vm14, 1.0, %v1789_v36  ;;  %v1474_v41 = vsel %vm566_vm15, 1.0, %v1789_v36  ;;  %vm276_vm1 = vcmp.eq.s32.totalorder %v2189_v58, %v2406_v63 }
  0xbb   : > { %1531 = vmatpush3.bf16.msra.mxu0 %v871_v28  ;;  %966 = vmatprep.mubr.bf16.mxu0 %v1788_v1  ;;  %v801_v18 = vsub.f32 %v1389_v37, %v1469_v40  ;;  %v806_v29 = vsub.f32 %v1394_v17, %v1474_v41  ;;  %v1379_v19 = vsel %vm271_vm0, 1.0, %v1789_v36  ;;  %v1384_v30 = vsel %vm276_vm1, 1.0, %v1789_v36 }
  0xbc   : > { %1532 = vmatprep.subr.bf16.mxu0 %v1789_v36  ;;  %1573 = vmatpush3.bf16.msra.mxu1 %v871_v28  ;;  %vm551_vm2 = vcmp.eq.s32.totalorder %v2186_v57, %v2409_v0  ;;  %vm556_vm3 = vcmp.eq.s32.totalorder %v2189_v58, %v2409_v0  ;;  %vm261_vm4 = vcmp.eq.s32.totalorder %v2194_v62, %v2406_v63  ;;  %v2491_v57 = vld [vmem:[#allocation5 + $0x10] sm:$0xff]   ;;  %vm1790_vm0 = vmmov 0  }
  0xbd   : > { %1038 = vmatmul.mubr.bf16.gmra.mxu1 %v2446_v14  ;;  %v1459_v42 = vsel %vm551_vm2, 1.0, %v1789_v36  ;;  %v1464_v43 = vsel %vm556_vm3, 1.0, %v1789_v36  ;;  %1566 = vmatprep.subr.bf16.mxu1 %v1789_v36  ;;  %vm266_vm5 = vcmp.eq.s32.totalorder %v2244_v46, %v2406_v63  ;;  %v861_v44 = vpack.c.bf16 %v806_v29, %v801_v18 }
  0xbe   : > { %1047 = vmatprep.mubr.bf16.mxu1 %v1788_v1  ;;  %v791_v58 = vsub.f32 %v1379_v19, %v1459_v42  ;;  %v796_v45 = vsub.f32 %v1384_v30, %v1464_v43  ;;  %v1369_v47 = vsel %vm261_vm4, 1.0, %v1789_v36  ;;  %v1374_v31 = vsel %vm266_vm5, 1.0, %v1789_v36 }
  0xbf   : > { %1533 = vmatpush3.bf16.msra.mxu0 %v866_v38  ;;  %vm541_vm6 = vcmp.eq.s32.totalorder %v2194_v62, %v2409_v0  ;;  %vm546_vm7 = vcmp.eq.s32.totalorder %v2244_v46, %v2409_v0  ;;  %vm251_vm8 = vcmp.eq.s32.totalorder %v2294_v25, %v2406_v63  ;;  %vm256_vm9 = vcmp.eq.s32.totalorder %v2297_v26, %v2406_v63 }
  0xc0   : > { %1534 = vmatprep.subr.bf16.mxu0 %v1789_v36  ;;  %v856_v32 = vpack.c.bf16 %v796_v45, %v791_v58  ;;  %1574 = vmatpush3.bf16.msra.mxu1 %v866_v38  ;;  %v1449_v48 = vsel %vm541_vm6, 1.0, %v1789_v36  ;;  %v1454_v49 = vsel %vm546_vm7, 1.0, %v1789_v36  ;;  %vm531_vm10 = vcmp.eq.s32.totalorder %v2294_v25, %v2409_v0 }
  0xc1   : > { %1567 = vmatprep.subr.bf16.mxu1 %v1789_v36  ;;  %vm536_vm11 = vcmp.eq.s32.totalorder %v2297_v26, %v2409_v0  ;;  %v781_v62 = vsub.f32 %v1369_v47, %v1449_v48  ;;  %v786_v46 = vsub.f32 %v1374_v31, %v1454_v49  ;;  %v1359_v50 = vsel %vm251_vm8, 1.0, %v1789_v36  ;;  %v1648_v26 = vld [vmem:[#allocation5 + $0x18] sm:$0xff]  }
  0xc2   : > { %967 = vmatmul.mubr.bf16.gmra.mxu0 %v2491_v57  ;;  %v1364_v51 = vsel %vm256_vm9, 1.0, %v1789_v36  ;;  %v1439_v52 = vsel %vm531_vm10, 1.0, %v1789_v36  ;;  %v1444_v25 = vsel %vm536_vm11, 1.0, %v1789_v36  ;;  %vm241_vm12 = vcmp.eq.s32.totalorder %v1930_v2, %v2406_v63 }
  0xc3   : > { %1535 = vmatpush3.bf16.msra.mxu0 %v861_v44  ;;  %976 = vmatprep.mubr.bf16.mxu0 %v1788_v1  ;;  %vm246_vm13 = vcmp.eq.s32.totalorder %v2302_v39, %v2406_v63  ;;  %vm521_vm14 = vcmp.eq.s32.totalorder %v1930_v2, %v2409_v0  ;;  %vm526_vm15 = vcmp.eq.s32.totalorder %v2302_v39, %v2409_v0  ;;  %v1349_v54 = vsel %vm241_vm12, 1.0, %v1789_v36  ;;  %v1649_v63 = vld [vmem:[#allocation5 + $0x20] ss:$0 sps:$4 sm:$0xff]  }
  0xc4   : > { %1536 = vmatprep.subr.bf16.mxu0 %v1789_v36  ;;  %1575 = vmatpush3.bf16.msra.mxu1 %v861_v44  ;;  %v851_v53 = vpack.c.bf16 %v786_v46, %v781_v62  ;;  %v771_v33 = vsub.f32 %v1359_v50, %v1439_v52  ;;  %v776_v34 = vsub.f32 %v1364_v51, %v1444_v25  ;;  %v1354_v55 = vsel %vm246_vm13, 1.0, %v1789_v36 }
  0xc5   : > { %1048 = vmatmul.mubr.bf16.gmra.mxu1 %v2491_v57  ;;  %1568 = vmatprep.subr.bf16.mxu1 %v1789_v36  ;;  %v1429_v56 = vsel %vm521_vm14, 1.0, %v1789_v36  ;;  %v1434_v2 = vsel %vm526_vm15, 1.0, %v1789_v36 }
  0xc6   : > { %1057 = vmatprep.mubr.bf16.mxu1 %v1788_v1  ;;  %v846_v39 = vpack.c.bf16 %v776_v34, %v771_v33  ;;  %v761_v59 = vsub.f32 %v1349_v54, %v1429_v56  ;;  %v766_v60 = vsub.f32 %v1354_v55, %v1434_v2 }
  0xc7   : > { %1537 = vmatpush3.bf16.msra.mxu0 %v856_v32 }
  0xc8   : > { %1538 = vmatprep.subr.bf16.mxu0 %v1789_v36  ;;  %1576 = vmatpush3.bf16.msra.mxu1 %v856_v32  ;;  %v841_v0 = vpack.c.bf16 %v766_v60, %v761_v59 }
  0xc9   : > { %1569 = vmatprep.subr.bf16.mxu1 %v1789_v36 }
  0xca   : > { %977 = vmatmul.mubr.bf16.gmra.mxu0 %v1648_v26 }
  0xcb   : > { %1539 = vmatpush3.bf16.msra.mxu0 %v851_v53  ;;  %986 = vmatprep.mubr.bf16.mxu0 %v1788_v1 }
  0xcc   : > { %1540 = vmatprep.subr.bf16.mxu0 %v1789_v36  ;;  %1577 = vmatpush3.bf16.msra.mxu1 %v851_v53 }
  0xcd   : > { %1058 = vmatmul.mubr.bf16.gmra.mxu1 %v1648_v26  ;;  %1570 = vmatprep.subr.bf16.mxu1 %v1789_v36 }
  0xce   : > { %1067 = vmatprep.mubr.bf16.mxu1 %v1788_v1 }
  0xcf   : > { %1541 = vmatpush3.bf16.msra.mxu0 %v846_v39 }
  0xd0   : > { %1542 = vmatprep.subr.bf16.mxu0 %v1789_v36  ;;  %1578 = vmatpush3.bf16.msra.mxu1 %v846_v39 }
  0xd1   : > { %1571 = vmatprep.subr.bf16.mxu1 %v1789_v36 }
  0xd2   : > { %987 = vmatmul.mubr.bf16.gmra.mxu0 %v1649_v63 }
  0xd3   : > { %1543 = vmatpush3.bf16.msra.mxu0 %v841_v0  ;;  %1544 = vmatprep.mubr.msk.bf16.mxu0 %vm1790_vm0, %v1789_v36 }
  0xd4   : > { %1579 = vmatpush3.bf16.msra.mxu1 %v841_v0 }
  0xd5   : > { %1068 = vmatmul.mubr.bf16.gmra.mxu1 %v1649_v63 }
  0xd6   : > { %1556 = vmatprep.mubr.msk.bf16.mxu1 %vm1790_vm0, %v1789_v36 }
  0xda   : > { %1545 = vmatmul.mubr.bf16.vlgmr.msra.gmra.mxu0 %v2403_v61 }
  0xdb   : > { %1548 = vmatprep.mubr.msk.bf16.mxu0 %vm1790_vm0, %v1789_v36 }
  0xdd   : > { %1557 = vmatmul.mubr.bf16.vlgmr.msra.gmra.mxu1 %v1648_v26 }
  0xde   : > { %1560 = vmatprep.mubr.msk.bf16.mxu1 %vm1790_vm0, %v1789_v36 }
  0xe2   : > { %1549 = vmatmul.mubr.bf16.gmra.mxu0 %v2446_v14 }
  0xe3   : > { %1552 = vmatprep.mubr.msk.bf16.mxu0 %vm1790_vm0, %v1789_v36 }
  0xe5   : > { %1561 = vmatmul.mubr.bf16.gmra.mxu1 %v1649_v63 }
  0xea   : > { %1553 = vmatmul.mubr.bf16.gmra.mxu0 %v2491_v57 }
 0x172   : > { %v948_v1 = vpop.f32.mrf.mxu0 }
 0x174   : > { %v950_v35 = vpop.f32.mrf.mxu0 }
 0x175   : > { %v1029_v6 = vpop.f32.mrf.mxu1 }
 0x176   : > { %v952_v5 = vpop.f32.mrf.mxu0 }
 0x177   : > { %v1031_v7 = vpop.f32.mrf.mxu1 }
 0x178   : > { %v954_v8 = vpop.f32.mrf.mxu0 }
 0x179   : > { %v1033_v9 = vpop.f32.mrf.mxu1 }
 0x17a   : > { %v958_v61 = vpop.f32.mrf.mxu0 }
 0x17b   : > { %v1035_v3 = vpop.f32.mrf.mxu1 }
 0x17c   : > { %v960_v10 = vpop.f32.mrf.mxu0 }
 0x17d   : > { %v1039_v11 = vpop.f32.mrf.mxu1 }
 0x17e   : > { %v962_v4 = vpop.f32.mrf.mxu0 }
 0x17f   : > { %v1041_v12 = vpop.f32.mrf.mxu1  ;;  %v1148_v17 = vadd.f32 %v962_v4, %v948_v1 }
 0x180   : > { %v964_v13 = vpop.f32.mrf.mxu0 }
 0x181   : > { %v1043_v15 = vpop.f32.mrf.mxu1  ;;  %v1149_v18 = vadd.f32 %v964_v13, %v950_v35 }
 0x182   : > { %v968_v20 = vpop.f32.mrf.mxu0  ;;  %v1150_v43 = vadd.f32 %v1043_v15, %v1029_v6 }
 0x183   : > { %v1045_v36 = vpop.f32.mrf.mxu1  ;;  %v1153_v38 = vadd.f32 %v968_v20, %v952_v5 }
 0x184   : > { %v970_v21 = vpop.f32.mrf.mxu0  ;;  %v1151_v53 = vadd.f32 %v1045_v36, %v1031_v7 }
 0x185   : > { %v1049_v14 = vpop.f32.mrf.mxu1  ;;  %v1154_v29 = vadd.f32 %v970_v21, %v954_v8 }
 0x186   : > { %v972_v22 = vpop.f32.mrf.mxu0  ;;  %v1155_v57 = vadd.f32 %v1049_v14, %v1033_v9 }
 0x187   : > { %v1051_v23 = vpop.f32.mrf.mxu1  ;;  %v1158_v58 = vadd.f32 %v972_v22, %v958_v61 }
 0x188   : > { %v974_v24 = vpop.f32.mrf.mxu0  ;;  %v1156_v48 = vadd.f32 %v1051_v23, %v1035_v3 }
 0x189   : > { %v1053_v28 = vpop.f32.mrf.mxu1  ;;  %v1159_v50 = vadd.f32 %v974_v24, %v960_v10 }
 0x18a   : > { %v978_v27 = vpop.f32.mrf.mxu0  ;;  %v1160_v33 = vadd.f32 %v1053_v28, %v1039_v11 }
 0x18b   : > { %v1055_v16 = vpop.f32.mrf.mxu1  ;;  %v1163_v19 = vadd.f32 %v1148_v17, %v978_v27 }
 0x18c   : > { %v980_v37 = vpop.f32.mrf.mxu0  ;;  %v1161_v63 = vadd.f32 %v1055_v16, %v1041_v12 }
 0x18d   : > { %v1059_v40 = vpop.f32.mrf.mxu1  ;;  %v1164_v45 = vadd.f32 %v1149_v18, %v980_v37  ;;  %v1178_v51 = vmul.f32 %v1163_v19, %v1163_v19 }
 0x18e   : > { %v982_v41 = vpop.f32.mrf.mxu0  ;;  %v1165_v49 = vadd.f32 %v1150_v43, %v1059_v40 }
 0x18f   : > { %v1061_v30 = vpop.f32.mrf.mxu1  ;;  %v1168_v42 = vadd.f32 %v1153_v38, %v982_v41  ;;  %v1179_v56 = vmul.f32 %v1164_v45, %v1164_v45 }
 0x190   : > { %v984_v44 = vpop.f32.mrf.mxu0  ;;  %v1180_v0 = vmul.f32 %v1165_v49, %v1165_v49  ;;  %v1166_v1 = vadd.f32 %v1151_v53, %v1061_v30 }
 0x191   : > { %v1183_v47 = vmul.f32 %v1168_v42, %v1168_v42  ;;  %v1063_v31 = vpop.f32.mrf.mxu1  ;;  %v1169_v32 = vadd.f32 %v1154_v29, %v984_v44 }
 0x192   : > { %v1170_v62 = vadd.f32 %v1155_v57, %v1063_v31  ;;  %v988_v46 = vpop.f32.mrf.mxu0  ;;  %v1181_v15 = vmul.f32 %v1166_v1, %v1166_v1 }
 0x193   : > { %v1184_v52 = vmul.f32 %v1169_v32, %v1169_v32  ;;  %v1065_v25 = vpop.f32.mrf.mxu1  ;;  %v1173_v26 = vadd.f32 %v1158_v58, %v988_v46  ;;  %v1188_v2 = vadd.f32 %v1183_v47, %v1178_v51 }
 0x194   : > { %v1185_v34 = vmul.f32 %v1170_v62, %v1170_v62  ;;  %v1171_v54 = vadd.f32 %v1156_v48, %v1065_v25  ;;  %v990_v55 = vpop.f32.mrf.mxu0 }
 0x195   : > { %v1193_v39 = vmul.f32 %v1173_v26, %v1173_v26  ;;  %v1069_v59 = vpop.f32.mrf.mxu1  ;;  %v1174_v60 = vadd.f32 %v1159_v50, %v990_v55  ;;  %v1189_v5 = vadd.f32 %v1184_v52, %v1179_v56 }
 0x196   : > { %v1175_v35 = vadd.f32 %v1160_v33, %v1069_v59  ;;  %v992_v6 = vpop.f32.mrf.mxu0  ;;  %v1190_v3 = vadd.f32 %v1185_v34, %v1180_v0  ;;  %v1186_v7 = vmul.f32 %v1171_v54, %v1171_v54 }
 0x197   : > { %v1198_v8 = vadd.f32 %v1193_v39, %v1188_v2  ;;  %v1194_v9 = vmul.f32 %v1174_v60, %v1174_v60  ;;  %v1071_v61 = vpop.f32.mrf.mxu1 }
 0x198   : > { %v1195_v10 = vmul.f32 %v1175_v35, %v1175_v35  ;;  %v1176_v11 = vadd.f32 %v1161_v63, %v1071_v61  ;;  %v993_v4 = vpop.f32.mrf.mxu0  ;;  %v1191_v22 = vadd.f32 %v1186_v7, %v1181_v15 }
 0x199   : > { %1650 = vrsqrt.f32 %v1198_v8  ;;  %v1073_v13 = vpop.f32.mrf.mxu1  ;;  %v1199_v36 = vadd.f32 %v1194_v9, %v1189_v5  ;;  %vm1205_vm1 = vcmp.eq.f32.partialorder %v1198_v8, inf  ;;  %v1208_v43 = vand.u32 2147483648, %v1198_v8 }
 0x19a   : > { %v1200_v20 = vadd.f32 %v1195_v10, %v1190_v3  ;;  %v1196_v21 = vmul.f32 %v1176_v11, %v1176_v11  ;;  %v1110_v12 = vpop.f32.mrf.mxu0  ;;  %vm1207_vm2 = vcmp.eq.f32.partialorder %v1198_v8, 0.0 }
 0x19b   : > { %v1074_v14 = vpop.f32.mrf.mxu1  ;;  %vm1212_vm5 = vcmp.eq.f32.partialorder %v1199_v36, inf  ;;  %vm1214_vm6 = vcmp.eq.f32.partialorder %v1199_v36, 0.0  ;;  %v1215_v25 = vand.u32 2147483648, %v1199_v36 }
 0x19c   : > { %1652 = vrsqrt.f32 %v1200_v20  ;;  %v1546_v23 = vpop.f32.mrf.mxu0  ;;  %v1201_v28 = vadd.f32 %v1196_v21, %v1191_v22  ;;  %vm1219_vm3 = vcmp.eq.f32.partialorder %v1200_v20, inf  ;;  %vm1221_vm4 = vcmp.eq.f32.partialorder %v1200_v20, 0.0 }
 0x19d   : > { %1654 = vrsqrt.f32 %v1199_v36  ;;  %v1134_v24 = vpop.f32.mrf.mxu1  ;;  %v1222_v62 = vand.u32 2147483648, %v1200_v20 }
 0x19e   : > { %v1113_v27 = vpop.f32.mrf.mxu0  ;;  %1656 = vrsqrt.f32 %v1201_v28  ;;  %vm1226_vm7 = vcmp.eq.f32.partialorder %v1201_v28, inf  ;;  %v1229_v59 = vand.u32 2147483648, %v1201_v28  ;;  %vm1228_vm8 = vcmp.eq.f32.partialorder %v1201_v28, 0.0 }
 0x19f   : > { %v1558_v16 = vpop.f32.mrf.mxu1 }
 0x1a0   : > { %v1547_v37 = vpop.f32.mrf.mxu0 }
 0x1a1   : > { %v1137_v17 = vpop.f32.mrf.mxu1 }
 0x1a2   : > { %v1118_v38 = vpop.f32.mrf.mxu0 }
 0x1a3   : > { %v1559_v40 = vpop.f32.mrf.mxu1 }
 0x1a4   : > { %v1550_v41 = vpop.f32.mrf.mxu0 }
 0x1a5   : > { %v1142_v18 = vpop.f32.mrf.mxu1 }
 0x1a6   : > { %v1651_v29 = vpop.eup %1650  ;;  %v1121_v19 = vpop.f32.mrf.mxu0 }
 0x1a7   : > { %v1204_v30 = vmul.f32 %v1651_v29, %v1198_v8  ;;  %v1562_v42 = vpop.f32.mrf.mxu1  ;;  %v1152_v45 = vadd.f32 %v1121_v19, %v1110_v12 }
 0x1a8   : > { %v1551_v57 = vpop.f32.mrf.mxu0 }
 0x1a9   : > { %v1653_v44 = vpop.eup %1652  ;;  %v1206_v58 = vsel %vm1205_vm1, %v1198_v8, %v1204_v30  ;;  %v1145_v47 = vpop.f32.mrf.mxu1  ;;  %v1167_v34 = vadd.f32 %v1152_v45, %v1134_v24 }
 0x1aa   : > { %v1655_v31 = vpop.eup %1654  ;;  %v1218_v32 = vmul.f32 %v1653_v44, %v1200_v20  ;;  %v1126_v48 = vpop.f32.mrf.mxu0  ;;  %v1209_v49 = vsel %vm1207_vm2, %v1208_v43, %v1206_v58 }
 0x1ab   : > { %v1211_v46 = vmul.f32 %v1655_v31, %v1199_v36  ;;  %v1157_v50 = vadd.f32 %v1126_v48, %v1113_v27  ;;  %v1563_v51 = vpop.f32.mrf.mxu1  ;;  %1238 = vst [vmem:[%s2550_s17] sm:$0xff] %v1209_v49  ;;  %v1657_v53 = vpop.eup %1656  ;;  %v1182_v35 = vmul.f32 %v1167_v34, %v1167_v34 }
 0x1ac   : > { %v1220_v52 = vsel %vm1219_vm3, %v1200_v20, %v1218_v32  ;;  %v1554_v26 = vpop.f32.mrf.mxu0  ;;  %v1225_v56 = vmul.f32 %v1657_v53, %v1201_v28 }
 0x1ad   : > { %v1213_v33 = vsel %vm1212_vm5, %v1199_v36, %v1211_v46  ;;  %v1172_v54 = vadd.f32 %v1157_v50, %v1137_v17  ;;  %v1223_v55 = vsel %vm1221_vm4, %v1222_v62, %v1220_v52 }
 0x1ae   : > { %v1129_v2 = vpop.f32.mrf.mxu0  ;;  %v1216_v39 = vsel %vm1214_vm6, %v1215_v25, %v1213_v33  ;;  %1240 = vst [vmem:[%s2550_s17 + $0x10] sm:$0xff] %v1223_v55  ;;  %v1227_v0 = vsel %vm1226_vm7, %v1201_v28, %v1225_v56 }
 0x1af   : > { %v1187_v60 = vmul.f32 %v1172_v54, %v1172_v54  ;;  %v1162_v63 = vadd.f32 %v1129_v2, %v1118_v38  ;;  %1239 = vst [vmem:[%s2550_s17 + $0x8] sm:$0xff] %v1216_v39  ;;  %v1230_v5 = vsel %vm1228_vm8, %v1229_v59, %v1227_v0 }
 0x1b0   : > { %v1555_v1 = vpop.f32.mrf.mxu0  ;;  %1241 = vst [vmem:[%s2550_s17 + $0x18] sm:$0xff] %v1230_v5 }
 0x1b1   : > { %v1177_v6 = vadd.f32 %v1162_v63, %v1142_v18  ;;  %v1192_v8 = vadd.f32 %v1187_v60, %v1182_v35 }
 0x1b3   : > { %v1197_v9 = vmul.f32 %v1177_v6, %v1177_v6 }
 0x1b5   : > { %v1202_v61 = vadd.f32 %v1197_v9, %v1192_v8 }
 0x1b7   : > { %1658 = vrsqrt.f32 %v1202_v61  ;;  %vm1233_vm9 = vcmp.eq.f32.partialorder %v1202_v61, inf  ;;  %v1236_v10 = vand.u32 2147483648, %v1202_v61  ;;  %vm1235_vm10 = vcmp.eq.f32.partialorder %v1202_v61, 0.0 }
 0x1c4   : > { %v1659_v3 = vpop.eup %1658 }
 0x1c5   : > { %v1232_v7 = vmul.f32 %v1659_v3, %v1202_v61 }
 0x1c7   : > { %v1234_v11 = vsel %vm1233_vm9, %v1202_v61, %v1232_v7 }
 0x1c8   : > { %v1237_v4 = vsel %vm1235_vm10, %v1236_v10, %v1234_v11 }
 0x1c9   : > { %1242 = vst [vmem:[%s2550_s17 + $0x20] sm:$0xff] %v1237_v4 }
 0x1ca   : > { %1727 = shalt.err (!%p1724_p0)
}
 0x1cb   : > { %s1728_s28 = scalar_lea.hbm %s2562_s23, 640  ;;  %s1732_s5 = scalar_lea.hbm %s2602_s2, 1280 }
 0x1cc   : > { %p1729_p11 = scmp.ne.s32.totalorder %s2562_s23, %s1728_s28  ;;  %p1733_p1 = scmp.lt.s32.totalorder %s2562_s23, %s2602_s2 }
 0x1cd   : > { %p1734_p4 = scmp.lt.s32.totalorder %s1732_s5, %s1728_s28 }
 0x1ce   : > { %p1730_p9 = pnand %p1729_p11, %p2618_p3 }
 0x1cf   : > { %p1735_p6 = por %p1734_p4, %p1733_p1 }
 0x1d0   : > { %p1731_p12 = pneg %p1730_p9 }
 0x1d2   : > { %p1736_p8 = pnand %p1735_p6, %p1731_p12 }
 0x1d4   : > { %1739 = shalt.err (!%p1736_p8)
}
 0x1d5   : > { %1589 = dma.vmem_to_hbm [thread:$0]  (%p2618_p3), %s1259_s14, 640, %s2562_s23, %s1244_s24  }
 0x1d6 PF: > { %s1270_s18 = sand.u32 1, %s1770_s9   ;;  %p2619_p5 = scmp.ne.s32.totalorder %s2608_s16, 0 }
 0x1d7   : > { %p2620_p7 = scmp.ge.s32.totalorder %s1782_s12, 2  ;;  %s1271_s22 = scalar_lea.sflag [#allocation4], %s1270_s18 }
 0x1d9   : > { %p1600_p10 = pnand %p2620_p7, %p2619_p5 }
 0x1db   : > { %p1601_p2 = pneg %p1600_p10 }
 0x1dd   : > { %1765 = dma.done.wait (%p1601_p2), %s1271_s22, 640  }
 0x1de   : > { %1767 = vsyncadd (%p1601_p2), %s1271_s22, 4294966656  ;;  %p16_p13 = scmp.ge.s32.totalorder %s1861_s21, 4   ;;  %s2621_s9 = smov %s1774_s10 }
 0x1df   : > { %s2622_s10 = smov %s1778_s11  ;;  %s2623_s11 = smov %s1878_s29 }
 0x1e0   : > { %s2624_s12 = smov %s1861_s21  ;;  %18 = sbr.rel (!%p16_p13) target bundleno = 6 (0x6), region = 77 }
 0x1e5   :  { %1276 = vsyncpa [#allocation3], 1 }
 0x1e6   :  { %1278 = vsyncpa [#allocation3 + $0x1], 1 }
 0x1e7   :  { %1279 = vsyncpa [#allocation6], 1 }
 0x1e8   :  { %1280 = vsyncpa [#allocation4], 1 }
 0x1e9   :  { %1282 = vsyncpa [#allocation4 + $0x1], 1 }

</bundles_post_ra>
